<compile_context>
chip_gen: v6e
topology: v6e:2x2x1
jax: 0.10.0
libtpu: 0.0.40
codegen_flags: <defaults>
</compile_context>

<pallas_src>
import jax
import jax.numpy as jnp
from jax import lax
from jax.experimental import pallas as pl
from jax.experimental.pallas import tpu as pltpu
import numpy as np


def _round_up(x, m):
    return ((x + m - 1) // m) * m


def _make_policy_kernel(T, obs_dim, gate_block):
    """Build the kernel closure for static T / obs_dim / per-gate lane block."""
    GB = gate_block  # 128: each GRU gate occupies its own 128-lane block

    def kernel(x_ref, h0_ref, wg_ref, bg_ref, wm_ref, bm_ref, mean_ref, hn_ref):
        # x_ref:    (Bp, T*obs)        batch-major, timestep t in lanes [t*obs,(t+1)*obs)
        # h0_ref:   (Bp, HP)           hidden, lanes H..HP-1 are zero
        # wg_ref:   (obs+HP, 3*GB)     [W_ih ; W_hh] transposed, per-gate 128-padded
        # bg_ref:   (2, 3*GB)          row0 = b_i (b_ir+b_hr | b_iz+b_hz | b_in), row1 = b_h (0|0|b_hn)
        # wm_ref:   (4, HP, HP)        lin0..lin3 transposed, zero-padded to 128x128
        # bm_ref:   (4, 1, HP)
        # mean_ref: (Bp, T*HP)         output, lane block t holds tanh(mean) at timestep t
        # hn_ref:   (Bp, HP)           output, final hidden state (lane-dense)
        Bp, HP = h0_ref.shape

        # ---- weights / biases hoisted once (fewer DMA'd inputs, sliced here) ----
        wg = wg_ref[...]
        w_ih = wg[:obs_dim, :]                 # (obs, 3*GB)
        w_hh = wg[obs_dim:, :]                 # (HP, 3*GB)   rows H..HP-1 are zero
        bg = bg_ref[...]
        b_i = bg[0:1, :]                       # (1, 3*GB)
        b_h = bg[1:2, :]

        # ---- rebuild time-major rows from the batch-major lane-blocked input ----
        xw = x_ref[...]                                                   # (Bp, T*obs)
        x_tm = jnp.concatenate(
            [xw[:, t * obs_dim:(t + 1) * obs_dim] for t in range(T)], axis=0)  # (T*Bp, obs)

        # ---- hoisted input-gate projection: one matmul, off the serial chain ----
        gi = jnp.dot(x_tm, w_ih, preferred_element_type=jnp.float32) + b_i     # (T*Bp, 3*GB)

        # ---- recurrence: fully unrolled, every slice 128-lane / 8-sublane aligned ----
        h = h0_ref[...]                                                   # (Bp, HP)
        hs = []
        for t in range(T):
            gi_t = gi[t * Bp:(t + 1) * Bp, :]                             # sublane-tile aligned
            gh = jnp.dot(h, w_hh, preferred_element_type=jnp.float32) + b_h
            r = jax.nn.sigmoid(gi_t[:, 0:GB] + gh[:, 0:GB])
            z = jax.nn.sigmoid(gi_t[:, GB:2 * GB] + gh[:, GB:2 * GB])
            n = jnp.tanh(gi_t[:, 2 * GB:3 * GB] + r * gh[:, 2 * GB:3 * GB])
            h = (1.0 - z) * n + z * h                                     # padded lanes stay 0
            hs.append(h)
        hn_ref[...] = h                                                   # lane-dense store

        # ---- actor_mean MLP over the whole GRU history at once (history in vregs) ----
        a = jnp.concatenate(hs, axis=0)                                   # (T*Bp, HP) time-major
        for i in range(3):
            a = jnp.maximum(
                jnp.dot(a, wm_ref[i], preferred_element_type=jnp.float32) + bm_ref[i], 0.0)
        m = jnp.tanh(jnp.dot(a, wm_ref[3], preferred_element_type=jnp.float32) + bm_ref[3])

        # ---- emit batch-major without any transpose: lane block t <- timestep t ----
        mean_ref[...] = jnp.concatenate(
            [m[t * Bp:(t + 1) * Bp, :] for t in range(T)], axis=1)        # (Bp, T*HP)

    return kernel


def init_policy_params(key, obs_dim, act_dim, hidden_size=32):
    """Deterministic init mirroring PyTorch default uniform(-1/sqrt(fan), 1/sqrt(fan)).
    Stored in PyTorch layout (out_features, in_features)."""
    ks = jax.random.split(key, 12)
    u = lambda k, shape, bound: jax.random.uniform(k, shape, jnp.float32, -bound, bound)
    gb = 1.0 / np.sqrt(hidden_size)
    params = {
        "w_ih": u(ks[0], (3 * hidden_size, obs_dim), gb),
        "w_hh": u(ks[1], (3 * hidden_size, hidden_size), gb),
        "b_ih": u(ks[2], (3 * hidden_size,), gb),
        "b_hh": u(ks[3], (3 * hidden_size,), gb),
    }
    dims = [(hidden_size, hidden_size)] * 3 + [(act_dim, hidden_size)]
    for i, (out_d, in_d) in enumerate(dims):
        lb = 1.0 / np.sqrt(in_d)
        params[f"lin{i}_w"] = u(ks[4 + 2 * i], (out_d, in_d), lb)
        params[f"lin{i}_b"] = u(ks[5 + 2 * i], (out_d,), lb)
    params["log_std"] = -3.0 * jnp.ones((act_dim,), jnp.float32)
    params["hidden_size"] = hidden_size
    params["act_dim"] = act_dim
    return params


def prepare_kernel_params(params):
    """One-time conversion: transpose / fuse / pad the PyTorch-layout params into the
    6 arrays the kernel consumes (per-gate 128-lane blocks, 128-padded hidden)."""
    H = params["hidden_size"]
    A = params["act_dim"]
    obs_dim = params["w_ih"].shape[1]
    GB = 128                      # per-gate lane block (vreg-aligned gate slices)
    HP = 128                      # hidden width padded to one full lane tile
    assert H <= GB and A <= HP

    wir, wiz, win = jnp.split(params["w_ih"], 3, axis=0)     # (H, obs) each
    whr, whz, whn = jnp.split(params["w_hh"], 3, axis=0)     # (H, H) each
    bir, biz, bin_ = jnp.split(params["b_ih"], 3)
    bhr, bhz, bhn = jnp.split(params["b_hh"], 3)

    gate_w = lambda w: jnp.pad(w.T, ((0, 0), (0, GB - H)))   # -> (in, GB)
    gate_b = lambda b: jnp.pad(b, (0, GB - H))                # -> (GB,)

    w_ih_cat = jnp.concatenate([gate_w(wir), gate_w(wiz), gate_w(win)], axis=1)   # (obs, 3GB)
    w_hh_cat = jnp.concatenate([gate_w(whr), gate_w(whz), gate_w(whn)], axis=1)   # (H, 3GB)
    w_hh_cat = jnp.pad(w_hh_cat, ((0, HP - H), (0, 0)))                            # (HP, 3GB)
    w_gru = jnp.concatenate([w_ih_cat, w_hh_cat], axis=0)                          # (obs+HP, 3GB)

    b_i = jnp.concatenate([gate_b(bir + bhr), gate_b(biz + bhz), gate_b(bin_)])
    b_h = jnp.concatenate([gate_b(jnp.zeros_like(bhr)), gate_b(jnp.zeros_like(bhz)),
                           gate_b(bhn)])
    b_gru = jnp.stack([b_i, b_h])                                                  # (2, 3GB)

    def mlp_pad(w, b):            # w is torch-layout (out, in)
        out_d, in_d = w.shape
        wt = jnp.pad(w.T, ((0, HP - in_d), (0, HP - out_d)))                       # (HP, HP)
        bt = jnp.pad(b, (0, HP - out_d)).reshape(1, HP)
        return wt, bt

    ws, bs = zip(*[mlp_pad(params[f"lin{i}_w"], params[f"lin{i}_b"]) for i in range(4)])
    w_mlp = jnp.stack(ws)          # (4, HP, HP)  lin0..lin2 + act_dim head
    b_mlp = jnp.stack(bs)          # (4, 1, HP)

    std = jnp.exp(jnp.clip(params["log_std"], -20.0, -1.0))   # constant, computed once

    return {
        "w_gru": w_gru.astype(jnp.float32),
        "b_gru": b_gru.astype(jnp.float32),
        "w_mlp": w_mlp.astype(jnp.float32),
        "b_mlp": b_mlp.astype(jnp.float32),
        "std": std.astype(jnp.float32),
        "hidden_size": H, "act_dim": A, "obs_dim": obs_dim,
        "h_pad": HP, "gate_block": GB,
    }


def policy_forward(kp, obs, hidden=None):
    """Returns (mean, std, new_hidden) exactly like PolicyNetwork.forward."""
    if obs.ndim == 2:
        obs = obs[:, None, :]
    B, T, obs_dim = obs.shape
    H = kp["hidden_size"]
    A = kp["act_dim"]
    HP = kp["h_pad"]
    GB = kp["gate_block"]
    Bp = _round_up(max(B, 1), 8)   # pad batch to one f32 sublane tile

    # Input plumbing: pad batch rows and flatten time into lanes (no transpose).
    x = obs.astype(jnp.float32)
    if Bp != B:
        x = jnp.pad(x, ((0, Bp - B), (0, 0), (0, 0)))
    x_wide = x.reshape(Bp, T * obs_dim)

    if hidden is None:
        h0 = jnp.zeros((Bp, HP), jnp.float32)
    else:
        h0 = jnp.pad(hidden[0].astype(jnp.float32), ((0, Bp - B), (0, HP - H)))

    vmem = pl.BlockSpec(memory_space=pltpu.MemorySpace.VMEM)
    out_shapes = (
        jax.ShapeDtypeStruct((Bp, T * HP), jnp.float32),   # mean: batch-major lane blocks
        jax.ShapeDtypeStruct((Bp, HP), jnp.float32),        # final hidden (lane-dense)
    )
    # TODO(synk): for large rollout batches, add a leading grid axis over Bp-chunks with
    # dimension_semantics=("parallel",) (v7x megacore) and, for long T, a grid over T
    # marked "arbitrary" with BlockSpec pipelining; at B=2/T=8 a single grid point wins.
    mean_wide, hn = pl.pallas_call(
        _make_policy_kernel(T, obs_dim, GB),
        out_shape=out_shapes,
        in_specs=[vmem] * 6,
        out_specs=(vmem, vmem),
    )(x_wide, h0, kp["w_gru"], kp["b_gru"], kp["w_mlp"], kp["b_mlp"])

    mean = mean_wide[:B].reshape(B, T, HP)[:, :, :A]        # already (B, T, ·); slice pads
    std = jnp.broadcast_to(kp["std"], mean.shape)            # precomputed constant
    new_hidden = hn[:B, :H][None]
    return mean, std, new_hidden


def _reference_forward(params, obs, hidden):
    """Pure-JAX reference (same math, PyTorch-layout params) for correctness check."""
    if obs.ndim == 2:
        obs = obs[:, None, :]
    wir, wiz, win = [w.T for w in jnp.split(params["w_ih"], 3, axis=0)]
    whr, whz, whn = [w.T for w in jnp.split(params["w_hh"], 3, axis=0)]
    bir, biz, bin_ = jnp.split(params["b_ih"], 3)
    bhr, bhz, bhn = jnp.split(params["b_hh"], 3)

    def cell(h, x):
        r = jax.nn.sigmoid(x @ wir + bir + h @ whr + bhr)
        z = jax.nn.sigmoid(x @ wiz + biz + h @ whz + bhz)
        n = jnp.tanh(x @ win + bin_ + r * (h @ whn + bhn))
        h = (1.0 - z) * n + z * h
        return h, h

    hT, outs = lax.scan(cell, hidden[0], jnp.transpose(obs, (1, 0, 2)))
    g = jnp.transpose(outs, (1, 0, 2))
    a = jax.nn.relu(g @ params["lin0_w"].T + params["lin0_b"])
    a = jax.nn.relu(a @ params["lin1_w"].T + params["lin1_b"])
    a = jax.nn.relu(a @ params["lin2_w"].T + params["lin2_b"])
    mean = jnp.tanh(a @ params["lin3_w"].T + params["lin3_b"])
    std = jnp.broadcast_to(jnp.exp(jnp.clip(params["log_std"], -20, -1)), mean.shape)
    return mean, std, hT[None]


if __name__ == "__main__":
    B, T, OBS, ACT, HID = 2, 8, 8, 4, 32
    key = jax.random.PRNGKey(0)
    k_params, k_obs = jax.random.split(key)
    params = init_policy_params(k_params, OBS, ACT, HID)
    kparams = prepare_kernel_params(params)          # one-time weight fusion / padding
    obs = jax.random.normal(k_obs, (B, T, OBS), jnp.float32)

    mean, std, new_hidden = policy_forward(kparams, obs)
    jax.block_until_ready((mean, std, new_hidden))

    ref_mean, ref_std, ref_hidden = _reference_forward(
        params, obs, jnp.zeros((1, B, HID), jnp.float32))
    assert mean.shape == (B, T, ACT) and std.shape == (B, T, ACT)
    assert new_hidden.shape == (1, B, HID)
    np.testing.assert_allclose(np.asarray(mean), np.asarray(ref_mean), atol=1e-5, rtol=1e-5)
    np.testing.assert_allclose(np.asarray(new_hidden), np.asarray(ref_hidden), atol=1e-5, rtol=1e-5)
    np.testing.assert_allclose(np.asarray(std), np.asarray(ref_std), atol=1e-6, rtol=1e-6)

    print("KERNEL_OK")
</pallas_src>

<mosaic_0001>
module attributes {stable_mosaic.version = 11 : i64} {
  func.func @kernel(%arg0: memref<8x64xf32, #tpu.memory_space<vmem>>, %arg1: memref<8x128xf32, #tpu.memory_space<vmem>>, %arg2: memref<136x384xf32, #tpu.memory_space<vmem>>, %arg3: memref<2x384xf32, #tpu.memory_space<vmem>>, %arg4: memref<4x128x128xf32, #tpu.memory_space<vmem>>, %arg5: memref<4x1x128xf32, #tpu.memory_space<vmem>>, %arg6: memref<8x1024xf32, #tpu.memory_space<vmem>>, %arg7: memref<8x128xf32, #tpu.memory_space<vmem>>) attributes {dimension_semantics = [], scalar_prefetch = 0 : i64, scratch_operands = 0 : i64, tpu.core_type = #tpu.core_type<tc>} {
    %c0 = arith.constant 0 : index
    %c0_0 = arith.constant 0 : index
    %0 = vector.load %arg2[%c0, %c0_0] : memref<136x384xf32, #tpu.memory_space<vmem>>, vector<136x384xf32>
    %1 = vector.extract_strided_slice %0 {offsets = [0, 0], sizes = [8, 384], strides = [1, 1]} : vector<136x384xf32> to vector<8x384xf32>
    %2 = vector.extract_strided_slice %0 {offsets = [8, 0], sizes = [128, 384], strides = [1, 1]} : vector<136x384xf32> to vector<128x384xf32>
    %c0_1 = arith.constant 0 : index
    %c0_2 = arith.constant 0 : index
    %3 = vector.load %arg3[%c0_1, %c0_2] : memref<2x384xf32, #tpu.memory_space<vmem>>, vector<2x384xf32>
    %4 = vector.extract_strided_slice %3 {offsets = [0, 0], sizes = [1, 384], strides = [1, 1]} : vector<2x384xf32> to vector<1x384xf32>
    %5 = vector.extract_strided_slice %3 {offsets = [1, 0], sizes = [1, 384], strides = [1, 1]} : vector<2x384xf32> to vector<1x384xf32>
    %c0_3 = arith.constant 0 : index
    %c0_4 = arith.constant 0 : index
    %6 = vector.load %arg0[%c0_3, %c0_4] : memref<8x64xf32, #tpu.memory_space<vmem>>, vector<8x64xf32>
    %7 = vector.extract_strided_slice %6 {offsets = [0, 0], sizes = [8, 8], strides = [1, 1]} : vector<8x64xf32> to vector<8x8xf32>
    %8 = vector.extract_strided_slice %6 {offsets = [0, 8], sizes = [8, 8], strides = [1, 1]} : vector<8x64xf32> to vector<8x8xf32>
    %9 = vector.extract_strided_slice %6 {offsets = [0, 16], sizes = [8, 8], strides = [1, 1]} : vector<8x64xf32> to vector<8x8xf32>
    %10 = vector.extract_strided_slice %6 {offsets = [0, 24], sizes = [8, 8], strides = [1, 1]} : vector<8x64xf32> to vector<8x8xf32>
    %11 = vector.extract_strided_slice %6 {offsets = [0, 32], sizes = [8, 8], strides = [1, 1]} : vector<8x64xf32> to vector<8x8xf32>
    %12 = vector.extract_strided_slice %6 {offsets = [0, 40], sizes = [8, 8], strides = [1, 1]} : vector<8x64xf32> to vector<8x8xf32>
    %13 = vector.extract_strided_slice %6 {offsets = [0, 48], sizes = [8, 8], strides = [1, 1]} : vector<8x64xf32> to vector<8x8xf32>
    %14 = vector.extract_strided_slice %6 {offsets = [0, 56], sizes = [8, 8], strides = [1, 1]} : vector<8x64xf32> to vector<8x8xf32>
    %15 = tpu.concatenate %7, %8, %9, %10, %11, %12, %13, %14 in 0 : vector<8x8xf32>, vector<8x8xf32>, vector<8x8xf32>, vector<8x8xf32>, vector<8x8xf32>, vector<8x8xf32>, vector<8x8xf32>, vector<8x8xf32> -> vector<64x8xf32>
    %cst = arith.constant dense<0.000000e+00> : vector<64x384xf32>
    %16 = tpu.matmul %15, %1, %cst {dimension_numbers = #tpu.dot_dimension_numbers<[1], [0], [0], [1], [0, 0, 1, 1], [], []>} : vector<64x8xf32>, vector<8x384xf32>, vector<64x384xf32> -> vector<64x384xf32>
    %17 = vector.broadcast %4 : vector<1x384xf32> to vector<64x384xf32>
    %18 = arith.addf %16, %17 : vector<64x384xf32>
    %c0_5 = arith.constant 0 : index
    %c0_6 = arith.constant 0 : index
    %19 = vector.load %arg1[%c0_5, %c0_6] : memref<8x128xf32, #tpu.memory_space<vmem>>, vector<8x128xf32>
    %20 = vector.extract_strided_slice %18 {offsets = [0, 0], sizes = [8, 384], strides = [1, 1]} : vector<64x384xf32> to vector<8x384xf32>
    %cst_7 = arith.constant dense<0.000000e+00> : vector<8x384xf32>
    %21 = tpu.matmul %19, %2, %cst_7 {dimension_numbers = #tpu.dot_dimension_numbers<[1], [0], [0], [1], [0, 0, 1, 1], [], []>} : vector<8x128xf32>, vector<128x384xf32>, vector<8x384xf32> -> vector<8x384xf32>
    %22 = vector.broadcast %5 : vector<1x384xf32> to vector<8x384xf32>
    %23 = arith.addf %21, %22 : vector<8x384xf32>
    %24 = vector.extract_strided_slice %20 {offsets = [0, 0], sizes = [8, 128], strides = [1, 1]} : vector<8x384xf32> to vector<8x128xf32>
    %25 = vector.extract_strided_slice %23 {offsets = [0, 0], sizes = [8, 128], strides = [1, 1]} : vector<8x384xf32> to vector<8x128xf32>
    %26 = arith.addf %24, %25 : vector<8x128xf32>
    %27 = arith.negf %26 : vector<8x128xf32>
    %28 = math.exp %27 : vector<8x128xf32>
    %cst_8 = arith.constant 1.000000e+00 : f32
    %29 = vector.broadcast %cst_8 : f32 to vector<8x128xf32>
    %30 = arith.addf %29, %28 : vector<8x128xf32>
    %31 = arith.divf %29, %30 : vector<8x128xf32>
    %32 = vector.extract_strided_slice %20 {offsets = [0, 128], sizes = [8, 128], strides = [1, 1]} : vector<8x384xf32> to vector<8x128xf32>
    %33 = vector.extract_strided_slice %23 {offsets = [0, 128], sizes = [8, 128], strides = [1, 1]} : vector<8x384xf32> to vector<8x128xf32>
    %34 = arith.addf %32, %33 : vector<8x128xf32>
    %35 = arith.negf %34 : vector<8x128xf32>
    %36 = math.exp %35 : vector<8x128xf32>
    %cst_9 = arith.constant 1.000000e+00 : f32
    %37 = vector.broadcast %cst_9 : f32 to vector<8x128xf32>
    %38 = arith.addf %37, %36 : vector<8x128xf32>
    %39 = arith.divf %37, %38 : vector<8x128xf32>
    %40 = vector.extract_strided_slice %20 {offsets = [0, 256], sizes = [8, 128], strides = [1, 1]} : vector<8x384xf32> to vector<8x128xf32>
    %41 = vector.extract_strided_slice %23 {offsets = [0, 256], sizes = [8, 128], strides = [1, 1]} : vector<8x384xf32> to vector<8x128xf32>
    %42 = arith.mulf %31, %41 : vector<8x128xf32>
    %43 = arith.addf %40, %42 : vector<8x128xf32>
    %44 = math.tanh %43 : vector<8x128xf32>
    %cst_10 = arith.constant 1.000000e+00 : f32
    %45 = vector.broadcast %cst_10 : f32 to vector<8x128xf32>
    %46 = arith.subf %45, %39 : vector<8x128xf32>
    %47 = arith.mulf %46, %44 : vector<8x128xf32>
    %48 = arith.mulf %39, %19 : vector<8x128xf32>
    %49 = arith.addf %47, %48 : vector<8x128xf32>
    %50 = vector.extract_strided_slice %18 {offsets = [8, 0], sizes = [8, 384], strides = [1, 1]} : vector<64x384xf32> to vector<8x384xf32>
    %cst_11 = arith.constant dense<0.000000e+00> : vector<8x384xf32>
    %51 = tpu.matmul %49, %2, %cst_11 {dimension_numbers = #tpu.dot_dimension_numbers<[1], [0], [0], [1], [0, 0, 1, 1], [], []>} : vector<8x128xf32>, vector<128x384xf32>, vector<8x384xf32> -> vector<8x384xf32>
    %52 = vector.broadcast %5 : vector<1x384xf32> to vector<8x384xf32>
    %53 = arith.addf %51, %52 : vector<8x384xf32>
    %54 = vector.extract_strided_slice %50 {offsets = [0, 0], sizes = [8, 128], strides = [1, 1]} : vector<8x384xf32> to vector<8x128xf32>
    %55 = vector.extract_strided_slice %53 {offsets = [0, 0], sizes = [8, 128], strides = [1, 1]} : vector<8x384xf32> to vector<8x128xf32>
    %56 = arith.addf %54, %55 : vector<8x128xf32>
    %57 = arith.negf %56 : vector<8x128xf32>
    %58 = math.exp %57 : vector<8x128xf32>
    %cst_12 = arith.constant 1.000000e+00 : f32
    %59 = vector.broadcast %cst_12 : f32 to vector<8x128xf32>
    %60 = arith.addf %59, %58 : vector<8x128xf32>
    %61 = arith.divf %59, %60 : vector<8x128xf32>
    %62 = vector.extract_strided_slice %50 {offsets = [0, 128], sizes = [8, 128], strides = [1, 1]} : vector<8x384xf32> to vector<8x128xf32>
    %63 = vector.extract_strided_slice %53 {offsets = [0, 128], sizes = [8, 128], strides = [1, 1]} : vector<8x384xf32> to vector<8x128xf32>
    %64 = arith.addf %62, %63 : vector<8x128xf32>
    %65 = arith.negf %64 : vector<8x128xf32>
    %66 = math.exp %65 : vector<8x128xf32>
    %cst_13 = arith.constant 1.000000e+00 : f32
    %67 = vector.broadcast %cst_13 : f32 to vector<8x128xf32>
    %68 = arith.addf %67, %66 : vector<8x128xf32>
    %69 = arith.divf %67, %68 : vector<8x128xf32>
    %70 = vector.extract_strided_slice %50 {offsets = [0, 256], sizes = [8, 128], strides = [1, 1]} : vector<8x384xf32> to vector<8x128xf32>
    %71 = vector.extract_strided_slice %53 {offsets = [0, 256], sizes = [8, 128], strides = [1, 1]} : vector<8x384xf32> to vector<8x128xf32>
    %72 = arith.mulf %61, %71 : vector<8x128xf32>
    %73 = arith.addf %70, %72 : vector<8x128xf32>
    %74 = math.tanh %73 : vector<8x128xf32>
    %cst_14 = arith.constant 1.000000e+00 : f32
    %75 = vector.broadcast %cst_14 : f32 to vector<8x128xf32>
    %76 = arith.subf %75, %69 : vector<8x128xf32>
    %77 = arith.mulf %76, %74 : vector<8x128xf32>
    %78 = arith.mulf %69, %49 : vector<8x128xf32>
    %79 = arith.addf %77, %78 : vector<8x128xf32>
    %80 = vector.extract_strided_slice %18 {offsets = [16, 0], sizes = [8, 384], strides = [1, 1]} : vector<64x384xf32> to vector<8x384xf32>
    %cst_15 = arith.constant dense<0.000000e+00> : vector<8x384xf32>
    %81 = tpu.matmul %79, %2, %cst_15 {dimension_numbers = #tpu.dot_dimension_numbers<[1], [0], [0], [1], [0, 0, 1, 1], [], []>} : vector<8x128xf32>, vector<128x384xf32>, vector<8x384xf32> -> vector<8x384xf32>
    %82 = vector.broadcast %5 : vector<1x384xf32> to vector<8x384xf32>
    %83 = arith.addf %81, %82 : vector<8x384xf32>
    %84 = vector.extract_strided_slice %80 {offsets = [0, 0], sizes = [8, 128], strides = [1, 1]} : vector<8x384xf32> to vector<8x128xf32>
    %85 = vector.extract_strided_slice %83 {offsets = [0, 0], sizes = [8, 128], strides = [1, 1]} : vector<8x384xf32> to vector<8x128xf32>
    %86 = arith.addf %84, %85 : vector<8x128xf32>
    %87 = arith.negf %86 : vector<8x128xf32>
    %88 = math.exp %87 : vector<8x128xf32>
    %cst_16 = arith.constant 1.000000e+00 : f32
    %89 = vector.broadcast %cst_16 : f32 to vector<8x128xf32>
    %90 = arith.addf %89, %88 : vector<8x128xf32>
    %91 = arith.divf %89, %90 : vector<8x128xf32>
    %92 = vector.extract_strided_slice %80 {offsets = [0, 128], sizes = [8, 128], strides = [1, 1]} : vector<8x384xf32> to vector<8x128xf32>
    %93 = vector.extract_strided_slice %83 {offsets = [0, 128], sizes = [8, 128], strides = [1, 1]} : vector<8x384xf32> to vector<8x128xf32>
    %94 = arith.addf %92, %93 : vector<8x128xf32>
    %95 = arith.negf %94 : vector<8x128xf32>
    %96 = math.exp %95 : vector<8x128xf32>
    %cst_17 = arith.constant 1.000000e+00 : f32
    %97 = vector.broadcast %cst_17 : f32 to vector<8x128xf32>
    %98 = arith.addf %97, %96 : vector<8x128xf32>
    %99 = arith.divf %97, %98 : vector<8x128xf32>
    %100 = vector.extract_strided_slice %80 {offsets = [0, 256], sizes = [8, 128], strides = [1, 1]} : vector<8x384xf32> to vector<8x128xf32>
    %101 = vector.extract_strided_slice %83 {offsets = [0, 256], sizes = [8, 128], strides = [1, 1]} : vector<8x384xf32> to vector<8x128xf32>
    %102 = arith.mulf %91, %101 : vector<8x128xf32>
    %103 = arith.addf %100, %102 : vector<8x128xf32>
    %104 = math.tanh %103 : vector<8x128xf32>
    %cst_18 = arith.constant 1.000000e+00 : f32
    %105 = vector.broadcast %cst_18 : f32 to vector<8x128xf32>
    %106 = arith.subf %105, %99 : vector<8x128xf32>
    %107 = arith.mulf %106, %104 : vector<8x128xf32>
    %108 = arith.mulf %99, %79 : vector<8x128xf32>
    %109 = arith.addf %107, %108 : vector<8x128xf32>
    %110 = vector.extract_strided_slice %18 {offsets = [24, 0], sizes = [8, 384], strides = [1, 1]} : vector<64x384xf32> to vector<8x384xf32>
    %cst_19 = arith.constant dense<0.000000e+00> : vector<8x384xf32>
    %111 = tpu.matmul %109, %2, %cst_19 {dimension_numbers = #tpu.dot_dimension_numbers<[1], [0], [0], [1], [0, 0, 1, 1], [], []>} : vector<8x128xf32>, vector<128x384xf32>, vector<8x384xf32> -> vector<8x384xf32>
    %112 = vector.broadcast %5 : vector<1x384xf32> to vector<8x384xf32>
    %113 = arith.addf %111, %112 : vector<8x384xf32>
    %114 = vector.extract_strided_slice %110 {offsets = [0, 0], sizes = [8, 128], strides = [1, 1]} : vector<8x384xf32> to vector<8x128xf32>
    %115 = vector.extract_strided_slice %113 {offsets = [0, 0], sizes = [8, 128], strides = [1, 1]} : vector<8x384xf32> to vector<8x128xf32>
    %116 = arith.addf %114, %115 : vector<8x128xf32>
    %117 = arith.negf %116 : vector<8x128xf32>
    %118 = math.exp %117 : vector<8x128xf32>
    %cst_20 = arith.constant 1.000000e+00 : f32
    %119 = vector.broadcast %cst_20 : f32 to vector<8x128xf32>
    %120 = arith.addf %119, %118 : vector<8x128xf32>
    %121 = arith.divf %119, %120 : vector<8x128xf32>
    %122 = vector.extract_strided_slice %110 {offsets = [0, 128], sizes = [8, 128], strides = [1, 1]} : vector<8x384xf32> to vector<8x128xf32>
    %123 = vector.extract_strided_slice %113 {offsets = [0, 128], sizes = [8, 128], strides = [1, 1]} : vector<8x384xf32> to vector<8x128xf32>
    %124 = arith.addf %122, %123 : vector<8x128xf32>
    %125 = arith.negf %124 : vector<8x128xf32>
    %126 = math.exp %125 : vector<8x128xf32>
    %cst_21 = arith.constant 1.000000e+00 : f32
    %127 = vector.broadcast %cst_21 : f32 to vector<8x128xf32>
    %128 = arith.addf %127, %126 : vector<8x128xf32>
    %129 = arith.divf %127, %128 : vector<8x128xf32>
    %130 = vector.extract_strided_slice %110 {offsets = [0, 256], sizes = [8, 128], strides = [1, 1]} : vector<8x384xf32> to vector<8x128xf32>
    %131 = vector.extract_strided_slice %113 {offsets = [0, 256], sizes = [8, 128], strides = [1, 1]} : vector<8x384xf32> to vector<8x128xf32>
    %132 = arith.mulf %121, %131 : vector<8x128xf32>
    %133 = arith.addf %130, %132 : vector<8x128xf32>
    %134 = math.tanh %133 : vector<8x128xf32>
    %cst_22 = arith.constant 1.000000e+00 : f32
    %135 = vector.broadcast %cst_22 : f32 to vector<8x128xf32>
    %136 = arith.subf %135, %129 : vector<8x128xf32>
    %137 = arith.mulf %136, %134 : vector<8x128xf32>
    %138 = arith.mulf %129, %109 : vector<8x128xf32>
    %139 = arith.addf %137, %138 : vector<8x128xf32>
    %140 = vector.extract_strided_slice %18 {offsets = [32, 0], sizes = [8, 384], strides = [1, 1]} : vector<64x384xf32> to vector<8x384xf32>
    %cst_23 = arith.constant dense<0.000000e+00> : vector<8x384xf32>
    %141 = tpu.matmul %139, %2, %cst_23 {dimension_numbers = #tpu.dot_dimension_numbers<[1], [0], [0], [1], [0, 0, 1, 1], [], []>} : vector<8x128xf32>, vector<128x384xf32>, vector<8x384xf32> -> vector<8x384xf32>
    %142 = vector.broadcast %5 : vector<1x384xf32> to vector<8x384xf32>
    %143 = arith.addf %141, %142 : vector<8x384xf32>
    %144 = vector.extract_strided_slice %140 {offsets = [0, 0], sizes = [8, 128], strides = [1, 1]} : vector<8x384xf32> to vector<8x128xf32>
    %145 = vector.extract_strided_slice %143 {offsets = [0, 0], sizes = [8, 128], strides = [1, 1]} : vector<8x384xf32> to vector<8x128xf32>
    %146 = arith.addf %144, %145 : vector<8x128xf32>
    %147 = arith.negf %146 : vector<8x128xf32>
    %148 = math.exp %147 : vector<8x128xf32>
    %cst_24 = arith.constant 1.000000e+00 : f32
    %149 = vector.broadcast %cst_24 : f32 to vector<8x128xf32>
    %150 = arith.addf %149, %148 : vector<8x128xf32>
    %151 = arith.divf %149, %150 : vector<8x128xf32>
    %152 = vector.extract_strided_slice %140 {offsets = [0, 128], sizes = [8, 128], strides = [1, 1]} : vector<8x384xf32> to vector<8x128xf32>
    %153 = vector.extract_strided_slice %143 {offsets = [0, 128], sizes = [8, 128], strides = [1, 1]} : vector<8x384xf32> to vector<8x128xf32>
    %154 = arith.addf %152, %153 : vector<8x128xf32>
    %155 = arith.negf %154 : vector<8x128xf32>
    %156 = math.exp %155 : vector<8x128xf32>
    %cst_25 = arith.constant 1.000000e+00 : f32
    %157 = vector.broadcast %cst_25 : f32 to vector<8x128xf32>
    %158 = arith.addf %157, %156 : vector<8x128xf32>
    %159 = arith.divf %157, %158 : vector<8x128xf32>
    %160 = vector.extract_strided_slice %140 {offsets = [0, 256], sizes = [8, 128], strides = [1, 1]} : vector<8x384xf32> to vector<8x128xf32>
    %161 = vector.extract_strided_slice %143 {offsets = [0, 256], sizes = [8, 128], strides = [1, 1]} : vector<8x384xf32> to vector<8x128xf32>
    %162 = arith.mulf %151, %161 : vector<8x128xf32>
    %163 = arith.addf %160, %162 : vector<8x128xf32>
    %164 = math.tanh %163 : vector<8x128xf32>
    %cst_26 = arith.constant 1.000000e+00 : f32
    %165 = vector.broadcast %cst_26 : f32 to vector<8x128xf32>
    %166 = arith.subf %165, %159 : vector<8x128xf32>
    %167 = arith.mulf %166, %164 : vector<8x128xf32>
    %168 = arith.mulf %159, %139 : vector<8x128xf32>
    %169 = arith.addf %167, %168 : vector<8x128xf32>
    %170 = vector.extract_strided_slice %18 {offsets = [40, 0], sizes = [8, 384], strides = [1, 1]} : vector<64x384xf32> to vector<8x384xf32>
    %cst_27 = arith.constant dense<0.000000e+00> : vector<8x384xf32>
    %171 = tpu.matmul %169, %2, %cst_27 {dimension_numbers = #tpu.dot_dimension_numbers<[1], [0], [0], [1], [0, 0, 1, 1], [], []>} : vector<8x128xf32>, vector<128x384xf32>, vector<8x384xf32> -> vector<8x384xf32>
    %172 = vector.broadcast %5 : vector<1x384xf32> to vector<8x384xf32>
    %173 = arith.addf %171, %172 : vector<8x384xf32>
    %174 = vector.extract_strided_slice %170 {offsets = [0, 0], sizes = [8, 128], strides = [1, 1]} : vector<8x384xf32> to vector<8x128xf32>
    %175 = vector.extract_strided_slice %173 {offsets = [0, 0], sizes = [8, 128], strides = [1, 1]} : vector<8x384xf32> to vector<8x128xf32>
    %176 = arith.addf %174, %175 : vector<8x128xf32>
    %177 = arith.negf %176 : vector<8x128xf32>
    %178 = math.exp %177 : vector<8x128xf32>
    %cst_28 = arith.constant 1.000000e+00 : f32
    %179 = vector.broadcast %cst_28 : f32 to vector<8x128xf32>
    %180 = arith.addf %179, %178 : vector<8x128xf32>
    %181 = arith.divf %179, %180 : vector<8x128xf32>
    %182 = vector.extract_strided_slice %170 {offsets = [0, 128], sizes = [8, 128], strides = [1, 1]} : vector<8x384xf32> to vector<8x128xf32>
    %183 = vector.extract_strided_slice %173 {offsets = [0, 128], sizes = [8, 128], strides = [1, 1]} : vector<8x384xf32> to vector<8x128xf32>
    %184 = arith.addf %182, %183 : vector<8x128xf32>
    %185 = arith.negf %184 : vector<8x128xf32>
    %186 = math.exp %185 : vector<8x128xf32>
    %cst_29 = arith.constant 1.000000e+00 : f32
    %187 = vector.broadcast %cst_29 : f32 to vector<8x128xf32>
    %188 = arith.addf %187, %186 : vector<8x128xf32>
    %189 = arith.divf %187, %188 : vector<8x128xf32>
    %190 = vector.extract_strided_slice %170 {offsets = [0, 256], sizes = [8, 128], strides = [1, 1]} : vector<8x384xf32> to vector<8x128xf32>
    %191 = vector.extract_strided_slice %173 {offsets = [0, 256], sizes = [8, 128], strides = [1, 1]} : vector<8x384xf32> to vector<8x128xf32>
    %192 = arith.mulf %181, %191 : vector<8x128xf32>
    %193 = arith.addf %190, %192 : vector<8x128xf32>
    %194 = math.tanh %193 : vector<8x128xf32>
    %cst_30 = arith.constant 1.000000e+00 : f32
    %195 = vector.broadcast %cst_30 : f32 to vector<8x128xf32>
    %196 = arith.subf %195, %189 : vector<8x128xf32>
    %197 = arith.mulf %196, %194 : vector<8x128xf32>
    %198 = arith.mulf %189, %169 : vector<8x128xf32>
    %199 = arith.addf %197, %198 : vector<8x128xf32>
    %200 = vector.extract_strided_slice %18 {offsets = [48, 0], sizes = [8, 384], strides = [1, 1]} : vector<64x384xf32> to vector<8x384xf32>
    %cst_31 = arith.constant dense<0.000000e+00> : vector<8x384xf32>
    %201 = tpu.matmul %199, %2, %cst_31 {dimension_numbers = #tpu.dot_dimension_numbers<[1], [0], [0], [1], [0, 0, 1, 1], [], []>} : vector<8x128xf32>, vector<128x384xf32>, vector<8x384xf32> -> vector<8x384xf32>
    %202 = vector.broadcast %5 : vector<1x384xf32> to vector<8x384xf32>
    %203 = arith.addf %201, %202 : vector<8x384xf32>
    %204 = vector.extract_strided_slice %200 {offsets = [0, 0], sizes = [8, 128], strides = [1, 1]} : vector<8x384xf32> to vector<8x128xf32>
    %205 = vector.extract_strided_slice %203 {offsets = [0, 0], sizes = [8, 128], strides = [1, 1]} : vector<8x384xf32> to vector<8x128xf32>
    %206 = arith.addf %204, %205 : vector<8x128xf32>
    %207 = arith.negf %206 : vector<8x128xf32>
    %208 = math.exp %207 : vector<8x128xf32>
    %cst_32 = arith.constant 1.000000e+00 : f32
    %209 = vector.broadcast %cst_32 : f32 to vector<8x128xf32>
    %210 = arith.addf %209, %208 : vector<8x128xf32>
    %211 = arith.divf %209, %210 : vector<8x128xf32>
    %212 = vector.extract_strided_slice %200 {offsets = [0, 128], sizes = [8, 128], strides = [1, 1]} : vector<8x384xf32> to vector<8x128xf32>
    %213 = vector.extract_strided_slice %203 {offsets = [0, 128], sizes = [8, 128], strides = [1, 1]} : vector<8x384xf32> to vector<8x128xf32>
    %214 = arith.addf %212, %213 : vector<8x128xf32>
    %215 = arith.negf %214 : vector<8x128xf32>
    %216 = math.exp %215 : vector<8x128xf32>
    %cst_33 = arith.constant 1.000000e+00 : f32
    %217 = vector.broadcast %cst_33 : f32 to vector<8x128xf32>
    %218 = arith.addf %217, %216 : vector<8x128xf32>
    %219 = arith.divf %217, %218 : vector<8x128xf32>
    %220 = vector.extract_strided_slice %200 {offsets = [0, 256], sizes = [8, 128], strides = [1, 1]} : vector<8x384xf32> to vector<8x128xf32>
    %221 = vector.extract_strided_slice %203 {offsets = [0, 256], sizes = [8, 128], strides = [1, 1]} : vector<8x384xf32> to vector<8x128xf32>
    %222 = arith.mulf %211, %221 : vector<8x128xf32>
    %223 = arith.addf %220, %222 : vector<8x128xf32>
    %224 = math.tanh %223 : vector<8x128xf32>
    %cst_34 = arith.constant 1.000000e+00 : f32
    %225 = vector.broadcast %cst_34 : f32 to vector<8x128xf32>
    %226 = arith.subf %225, %219 : vector<8x128xf32>
    %227 = arith.mulf %226, %224 : vector<8x128xf32>
    %228 = arith.mulf %219, %199 : vector<8x128xf32>
    %229 = arith.addf %227, %228 : vector<8x128xf32>
    %230 = vector.extract_strided_slice %18 {offsets = [56, 0], sizes = [8, 384], strides = [1, 1]} : vector<64x384xf32> to vector<8x384xf32>
    %cst_35 = arith.constant dense<0.000000e+00> : vector<8x384xf32>
    %231 = tpu.matmul %229, %2, %cst_35 {dimension_numbers = #tpu.dot_dimension_numbers<[1], [0], [0], [1], [0, 0, 1, 1], [], []>} : vector<8x128xf32>, vector<128x384xf32>, vector<8x384xf32> -> vector<8x384xf32>
    %232 = vector.broadcast %5 : vector<1x384xf32> to vector<8x384xf32>
    %233 = arith.addf %231, %232 : vector<8x384xf32>
    %234 = vector.extract_strided_slice %230 {offsets = [0, 0], sizes = [8, 128], strides = [1, 1]} : vector<8x384xf32> to vector<8x128xf32>
    %235 = vector.extract_strided_slice %233 {offsets = [0, 0], sizes = [8, 128], strides = [1, 1]} : vector<8x384xf32> to vector<8x128xf32>
    %236 = arith.addf %234, %235 : vector<8x128xf32>
    %237 = arith.negf %236 : vector<8x128xf32>
    %238 = math.exp %237 : vector<8x128xf32>
    %cst_36 = arith.constant 1.000000e+00 : f32
    %239 = vector.broadcast %cst_36 : f32 to vector<8x128xf32>
    %240 = arith.addf %239, %238 : vector<8x128xf32>
    %241 = arith.divf %239, %240 : vector<8x128xf32>
    %242 = vector.extract_strided_slice %230 {offsets = [0, 128], sizes = [8, 128], strides = [1, 1]} : vector<8x384xf32> to vector<8x128xf32>
    %243 = vector.extract_strided_slice %233 {offsets = [0, 128], sizes = [8, 128], strides = [1, 1]} : vector<8x384xf32> to vector<8x128xf32>
    %244 = arith.addf %242, %243 : vector<8x128xf32>
    %245 = arith.negf %244 : vector<8x128xf32>
    %246 = math.exp %245 : vector<8x128xf32>
    %cst_37 = arith.constant 1.000000e+00 : f32
    %247 = vector.broadcast %cst_37 : f32 to vector<8x128xf32>
    %248 = arith.addf %247, %246 : vector<8x128xf32>
    %249 = arith.divf %247, %248 : vector<8x128xf32>
    %250 = vector.extract_strided_slice %230 {offsets = [0, 256], sizes = [8, 128], strides = [1, 1]} : vector<8x384xf32> to vector<8x128xf32>
    %251 = vector.extract_strided_slice %233 {offsets = [0, 256], sizes = [8, 128], strides = [1, 1]} : vector<8x384xf32> to vector<8x128xf32>
    %252 = arith.mulf %241, %251 : vector<8x128xf32>
    %253 = arith.addf %250, %252 : vector<8x128xf32>
    %254 = math.tanh %253 : vector<8x128xf32>
    %cst_38 = arith.constant 1.000000e+00 : f32
    %255 = vector.broadcast %cst_38 : f32 to vector<8x128xf32>
    %256 = arith.subf %255, %249 : vector<8x128xf32>
    %257 = arith.mulf %256, %254 : vector<8x128xf32>
    %258 = arith.mulf %249, %229 : vector<8x128xf32>
    %259 = arith.addf %257, %258 : vector<8x128xf32>
    %c0_39 = arith.constant 0 : index
    %c0_40 = arith.constant 0 : index
    %260 = vector.load %arg7[%c0_39, %c0_40] : memref<8x128xf32, #tpu.memory_space<vmem>>, vector<8x128xf32>
    tpu.vector_store %arg7[%c0_39, %c0_40], %259 {strides = array<i32>} : memref<8x128xf32, #tpu.memory_space<vmem>>, vector<8x128xf32>,
    %261 = tpu.concatenate %49, %79, %109, %139, %169, %199, %229, %259 in 0 : vector<8x128xf32>, vector<8x128xf32>, vector<8x128xf32>, vector<8x128xf32>, vector<8x128xf32>, vector<8x128xf32>, vector<8x128xf32>, vector<8x128xf32> -> vector<64x128xf32>
    %c0_41 = arith.constant 0 : index
    %c0_42 = arith.constant 0 : index
    %c0_43 = arith.constant 0 : index
    %262 = vector.load %arg4[%c0_41, %c0_42, %c0_43] : memref<4x128x128xf32, #tpu.memory_space<vmem>>, vector<1x128x128xf32>
    %263 = vector.shape_cast %262 : vector<1x128x128xf32> to vector<128x128xf32>
    %cst_44 = arith.constant dense<0.000000e+00> : vector<64x128xf32>
    %264 = tpu.matmul %261, %263, %cst_44 {dimension_numbers = #tpu.dot_dimension_numbers<[1], [0], [0], [1], [0, 0, 1, 1], [], []>} : vector<64x128xf32>, vector<128x128xf32>, vector<64x128xf32> -> vector<64x128xf32>
    %c0_45 = arith.constant 0 : index
    %c0_46 = arith.constant 0 : index
    %c0_47 = arith.constant 0 : index
    %265 = vector.load %arg5[%c0_45, %c0_46, %c0_47] : memref<4x1x128xf32, #tpu.memory_space<vmem>>, vector<1x1x128xf32>
    %266 = vector.shape_cast %265 : vector<1x1x128xf32> to vector<1x128xf32>
    %267 = vector.broadcast %266 : vector<1x128xf32> to vector<64x128xf32>
    %268 = arith.addf %264, %267 : vector<64x128xf32>
    %cst_48 = arith.constant 0.000000e+00 : f32
    %269 = vector.broadcast %cst_48 : f32 to vector<64x128xf32>
    %270 = arith.maximumf %268, %269 : vector<64x128xf32>
    %c1 = arith.constant 1 : index
    %c0_49 = arith.constant 0 : index
    %c0_50 = arith.constant 0 : index
    %271 = vector.load %arg4[%c1, %c0_49, %c0_50] : memref<4x128x128xf32, #tpu.memory_space<vmem>>, vector<1x128x128xf32>
    %272 = vector.shape_cast %271 : vector<1x128x128xf32> to vector<128x128xf32>
    %cst_51 = arith.constant dense<0.000000e+00> : vector<64x128xf32>
    %273 = tpu.matmul %270, %272, %cst_51 {dimension_numbers = #tpu.dot_dimension_numbers<[1], [0], [0], [1], [0, 0, 1, 1], [], []>} : vector<64x128xf32>, vector<128x128xf32>, vector<64x128xf32> -> vector<64x128xf32>
    %c1_52 = arith.constant 1 : index
    %c0_53 = arith.constant 0 : index
    %c0_54 = arith.constant 0 : index
    %274 = vector.load %arg5[%c1_52, %c0_53, %c0_54] : memref<4x1x128xf32, #tpu.memory_space<vmem>>, vector<1x1x128xf32>
    %275 = vector.shape_cast %274 : vector<1x1x128xf32> to vector<1x128xf32>
    %276 = vector.broadcast %275 : vector<1x128xf32> to vector<64x128xf32>
    %277 = arith.addf %273, %276 : vector<64x128xf32>
    %cst_55 = arith.constant 0.000000e+00 : f32
    %278 = vector.broadcast %cst_55 : f32 to vector<64x128xf32>
    %279 = arith.maximumf %277, %278 : vector<64x128xf32>
    %c2 = arith.constant 2 : index
    %c0_56 = arith.constant 0 : index
    %c0_57 = arith.constant 0 : index
    %280 = vector.load %arg4[%c2, %c0_56, %c0_57] : memref<4x128x128xf32, #tpu.memory_space<vmem>>, vector<1x128x128xf32>
    %281 = vector.shape_cast %280 : vector<1x128x128xf32> to vector<128x128xf32>
    %cst_58 = arith.constant dense<0.000000e+00> : vector<64x128xf32>
    %282 = tpu.matmul %279, %281, %cst_58 {dimension_numbers = #tpu.dot_dimension_numbers<[1], [0], [0], [1], [0, 0, 1, 1], [], []>} : vector<64x128xf32>, vector<128x128xf32>, vector<64x128xf32> -> vector<64x128xf32>
    %c2_59 = arith.constant 2 : index
    %c0_60 = arith.constant 0 : index
    %c0_61 = arith.constant 0 : index
    %283 = vector.load %arg5[%c2_59, %c0_60, %c0_61] : memref<4x1x128xf32, #tpu.memory_space<vmem>>, vector<1x1x128xf32>
    %284 = vector.shape_cast %283 : vector<1x1x128xf32> to vector<1x128xf32>
    %285 = vector.broadcast %284 : vector<1x128xf32> to vector<64x128xf32>
    %286 = arith.addf %282, %285 : vector<64x128xf32>
    %cst_62 = arith.constant 0.000000e+00 : f32
    %287 = vector.broadcast %cst_62 : f32 to vector<64x128xf32>
    %288 = arith.maximumf %286, %287 : vector<64x128xf32>
    %c3 = arith.constant 3 : index
    %c0_63 = arith.constant 0 : index
    %c0_64 = arith.constant 0 : index
    %289 = vector.load %arg4[%c3, %c0_63, %c0_64] : memref<4x128x128xf32, #tpu.memory_space<vmem>>, vector<1x128x128xf32>
    %290 = vector.shape_cast %289 : vector<1x128x128xf32> to vector<128x128xf32>
    %cst_65 = arith.constant dense<0.000000e+00> : vector<64x128xf32>
    %291 = tpu.matmul %288, %290, %cst_65 {dimension_numbers = #tpu.dot_dimension_numbers<[1], [0], [0], [1], [0, 0, 1, 1], [], []>} : vector<64x128xf32>, vector<128x128xf32>, vector<64x128xf32> -> vector<64x128xf32>
    %c3_66 = arith.constant 3 : index
    %c0_67 = arith.constant 0 : index
    %c0_68 = arith.constant 0 : index
    %292 = vector.load %arg5[%c3_66, %c0_67, %c0_68] : memref<4x1x128xf32, #tpu.memory_space<vmem>>, vector<1x1x128xf32>
    %293 = vector.shape_cast %292 : vector<1x1x128xf32> to vector<1x128xf32>
    %294 = vector.broadcast %293 : vector<1x128xf32> to vector<64x128xf32>
    %295 = arith.addf %291, %294 : vector<64x128xf32>
    %296 = math.tanh %295 : vector<64x128xf32>
    %297 = vector.extract_strided_slice %296 {offsets = [0, 0], sizes = [8, 128], strides = [1, 1]} : vector<64x128xf32> to vector<8x128xf32>
    %298 = vector.extract_strided_slice %296 {offsets = [8, 0], sizes = [8, 128], strides = [1, 1]} : vector<64x128xf32> to vector<8x128xf32>
    %299 = vector.extract_strided_slice %296 {offsets = [16, 0], sizes = [8, 128], strides = [1, 1]} : vector<64x128xf32> to vector<8x128xf32>
    %300 = vector.extract_strided_slice %296 {offsets = [24, 0], sizes = [8, 128], strides = [1, 1]} : vector<64x128xf32> to vector<8x128xf32>
    %301 = vector.extract_strided_slice %296 {offsets = [32, 0], sizes = [8, 128], strides = [1, 1]} : vector<64x128xf32> to vector<8x128xf32>
    %302 = vector.extract_strided_slice %296 {offsets = [40, 0], sizes = [8, 128], strides = [1, 1]} : vector<64x128xf32> to vector<8x128xf32>
    %303 = vector.extract_strided_slice %296 {offsets = [48, 0], sizes = [8, 128], strides = [1, 1]} : vector<64x128xf32> to vector<8x128xf32>
    %304 = vector.extract_strided_slice %296 {offsets = [56, 0], sizes = [8, 128], strides = [1, 1]} : vector<64x128xf32> to vector<8x128xf32>
    %305 = tpu.concatenate %297, %298, %299, %300, %301, %302, %303, %304 in 1 : vector<8x128xf32>, vector<8x128xf32>, vector<8x128xf32>, vector<8x128xf32>, vector<8x128xf32>, vector<8x128xf32>, vector<8x128xf32>, vector<8x128xf32> -> vector<8x1024xf32>
    %c0_69 = arith.constant 0 : index
    %c0_70 = arith.constant 0 : index
    %306 = vector.load %arg6[%c0_69, %c0_70] : memref<8x1024xf32, #tpu.memory_space<vmem>>, vector<8x1024xf32>
    tpu.vector_store %arg6[%c0_69, %c0_70], %305 {strides = array<i32>} : memref<8x1024xf32, #tpu.memory_space<vmem>>, vector<8x1024xf32>,
    return
  }
}

</mosaic_0001>

<bundles_post_ra>
// kernel: tpu_custom_call.1
= control target key start
LH: loop header
LB: loop body
LE: loop exit
PB: predicated region body
PF: predicated region fallthrough
CT: control target
= control target key end

     0   :  { %13 = vsyncpa [#allocation3], 0  ;;  %s4449_s0 = inlined_call_operand.hbm [shape: f32[8,64], index: 0, kind: input, shape index: {}]   ;;  %s4450_s1 = inlined_call_operand.hbm [shape: f32[8,128], index: 1, kind: input, shape index: {}]   ;;  %s4451_s2 = inlined_call_operand.hbm [shape: f32[136,384], index: 2, kind: input, shape index: {}]   ;;  %s4452_s3 = inlined_call_operand.hbm [shape: f32[2,384], index: 3, kind: input, shape index: {}]   ;;  %s4453_s4 = inlined_call_operand.hbm [shape: f32[4,128,128], index: 4, kind: input, shape index: {}]   ;;  %s4454_s5 = inlined_call_operand.vmem [shape: f32[4,1,128], index: 5, kind: input, shape index: {}]   ;;  %s4455_s6 = inlined_call_operand.hbm [shape: f32[8,1024], index: 6, kind: output, shape index: {0}]   ;;  %s4456_s7 = inlined_call_operand.hbm [shape: f32[8,128], index: 7, kind: output, shape index: {1}]  }
   0x1   :  { %14 = vsyncpa [#allocation6], 0 }
   0x2   :  { %15 = vsyncpa [#allocation9], 0 }
   0x3   :  { %16 = vsyncpa [#allocation4], 0 }
   0x4   :  { %17 = vsyncpa [#allocation13], 0  ;;  %s3398_s24 = smov [#allocation5]   ;;  %s3399_s26 = smov [#allocation8]  }
   0x5   :  { %s34_s25 = sshll.u32 %s3398_s24, 4  ;;  %s56_s27 = sshll.u32 %s3399_s26, 4  ;;  %s35_s25 = int_to_ptr.vmem [resolvable:$true] %s34_s25  ;;  %s57_s27 = int_to_ptr.vmem [resolvable:$true] %s56_s27 }
   0x6   :  { %s3256_s28 = scalar_lea.vmem %s35_s25, 128  ;;  %p3261_p1 = scmp.lt.s32.totalorder %s35_s25, %s35_s25 }
   0x7   :  { %p3257_p0 = scmp.ne.s32.totalorder %s35_s25, %s3256_s28  ;;  %p3262_p2 = scmp.lt.s32.totalorder %s3256_s28, %s3256_s28 }
   0x9   :  { %p3263_p3 = por %p3262_p2, %p3261_p1 }
   0xb   :  { %p3264_p4 = pnand %p3263_p3, %p3257_p0 }
   0xd   :  { %3267 = shalt.err (!%p3264_p4)
}
   0xe   :  { %37 = dma.hbm_to_vmem [thread:$0]  %s4450_s1, 128, %s35_s25, [#allocation6]  }
   0xf   :  { %s3276_s8 = scalar_lea.vmem %s57_s27, 96  ;;  %p3281_p6 = scmp.lt.s32.totalorder %s57_s27, %s57_s27 }
  0x10   :  { %p3277_p5 = scmp.ne.s32.totalorder %s57_s27, %s3276_s8  ;;  %p3282_p7 = scmp.lt.s32.totalorder %s3276_s8, %s3276_s8 }
  0x12   :  { %p3283_p8 = por %p3282_p7, %p3281_p6 }
  0x14   :  { %p3284_p9 = pnand %p3283_p8, %p3277_p5 }
  0x16   :  { %3287 = shalt.err (!%p3284_p9)
}
  0x17   :  { %59 = dma.hbm_to_vmem [thread:$0]  %s4452_s3, 96, %s57_s27, [#allocation9]  }
  0x18   :  { %s3400_s11 = smov [#allocation2]   ;;  %s3401_s13 = smov [#allocation7]  }
  0x19   :  { %s24_s12 = sshll.u32 %s3400_s11, 4  ;;  %s43_s14 = sshll.u32 %s3401_s13, 4  ;;  %s25_s12 = int_to_ptr.vmem [resolvable:$true] %s24_s12  ;;  %s44_s14 = int_to_ptr.vmem [resolvable:$true] %s43_s14 }
  0x1a   :  { %s3296_s15 = scalar_lea.vmem %s25_s12, 128  ;;  %p3301_p11 = scmp.lt.s32.totalorder %s25_s12, %s25_s12 }
  0x1b   :  { %p3297_p10 = scmp.ne.s32.totalorder %s25_s12, %s3296_s15  ;;  %p3302_p12 = scmp.lt.s32.totalorder %s3296_s15, %s3296_s15 }
  0x1d   :  { %p3303_p13 = por %p3302_p12, %p3301_p11 }
  0x1f   :  { %p3304_p0 = pnand %p3303_p13, %p3297_p10 }
  0x21   :  { %3307 = shalt.err (!%p3304_p0)
}
  0x22   :  { %27 = dma.hbm_to_vmem [thread:$0]  %s4449_s0, 128, %s25_s12, [#allocation3]  }
  0x23   :  { %s3316_s17 = scalar_lea.vmem %s44_s14, 6528  ;;  %p3321_p2 = scmp.lt.s32.totalorder %s44_s14, %s44_s14 }
  0x24   :  { %p3317_p1 = scmp.ne.s32.totalorder %s44_s14, %s3316_s17  ;;  %p3322_p3 = scmp.lt.s32.totalorder %s3316_s17, %s3316_s17 }
  0x26   :  { %p3323_p4 = por %p3322_p3, %p3321_p2 }
  0x28   :  { %p3324_p5 = pnand %p3323_p4, %p3317_p1 }
  0x2a   :  { %3327 = shalt.err (!%p3324_p5)
}
  0x2b   :  { %s3402_s3 = smov 384   ;;  %s3403_s18 = smov 24  }
  0x2c   :  { %49 = dma.hbm_to_vmem [thread:$0]  %s4451_s2, 6528, %s44_s14, [#allocation6], %s3402_s3, %s3402_s3, %s3403_s18  }
  0x2d   :  { %s3404_s21 = smov [#allocation10]  }
  0x2e   :  { %s65_s22 = sshll.u32 %s3404_s21, 4  ;;  %s66_s22 = int_to_ptr.vmem [resolvable:$true] %s65_s22 }
  0x2f   :  { %s3336_s23 = scalar_lea.vmem %s66_s22, 8192  ;;  %p3341_p7 = scmp.lt.s32.totalorder %s66_s22, %s66_s22 }
  0x30   :  { %p3337_p6 = scmp.ne.s32.totalorder %s66_s22, %s3336_s23  ;;  %p3342_p8 = scmp.lt.s32.totalorder %s3336_s23, %s3336_s23 }
  0x32   :  { %p3343_p9 = por %p3342_p8, %p3341_p7 }
  0x34   :  { %p3344_p10 = pnand %p3343_p9, %p3337_p6 }
  0x36   :  { %3347 = shalt.err (!%p3344_p10)
}
  0x37   :  { %s3405_s0 = smov 128   ;;  %s3406_s24 = smov 8  }
  0x38   :  { %71 = dma.hbm_to_vmem [thread:$0]  %s4453_s4, 8192, %s66_s22, [#allocation9], %s3405_s0, %s3405_s0, %s3406_s24  }
  0x39   :  { %3388 = dma.done.wait [#allocation3], 128  }
  0x3a   :  { %3389 = vsyncadd [#allocation3], 4294967168 }
  0x3b   :  { %3390 = dma.done.wait [#allocation6], 6656  }
  0x3c   :  { %3391 = vsyncadd [#allocation6], 4294960640 }
  0x3d   :  { %3392 = dma.done.wait [#allocation9], 8288  }
  0x3e   :  { %3393 = vsyncadd [#allocation9], 4294959008  ;;  %v4457_v0 = vmov 0.0   ;;  %v141_v1 = vld [vmem:[#allocation2] sm:$0xff]  ;;  %v90_v2 = vld [vmem:[#allocation7 + $0x8] sm:$0xff]  ;;  %s3408_s2 = smov 120   ;;  %v158_v61 = vlaneseq }
  0x3f   :  { %266 = vmatprep.mubr.f32.mxu0 %v4457_v0  ;;  %v89_v3 = vld [vmem:[#allocation7] sm:$0xff]  ;;  %143 = vrot.lane.b32.xlu0 %v141_v1, %s3408_s2  ;;  %s3409_s27 = smov 104   ;;  %vm185_vm0 = vcmask 64512   ;;  %v3474_v4 = vld [vmem:[#allocation7 + $0x188] sm:$0xff]  ;;  %v91_v5 = vld [vmem:[#allocation7 + $0x10] sm:$0xff]  ;;  %s3410_s4 = smov 112  }
  0x40   :  { %147 = vrot.lane.b32.xlu1 %v141_v1, %s3409_s27  ;;  %4505 = vst [vmem:[#allocation19_spill] sm:$0xff] %v3474_v4  ;;  %232 = vmatprep.subr.mxu0 %v90_v2  ;;  %v3477_v6 = vld [vmem:[#allocation7 + $0x180] sm:$0xff]  ;;  %v3481_v7 = vld [vmem:[#allocation7 + $0x170] sm:$0xff]  ;;  %s3411_s28 = smov 96   ;;  %v3483_v8 = vld [vmem:[#allocation7 + $0x168] sm:$0xff]  ;;  %s3412_s29 = smov 88  }
  0x41   :  { %2616 = vmatprep.mubr.msk.f32.mxu1 %vm185_vm0, %v141_v1  ;;  %233 = vmatpush1.msra.mxu0 %v89_v3  ;;  %v3488_v9 = vld [vmem:[#allocation7 + $0x158] sm:$0xff]  ;;  %v3491_v10 = vld [vmem:[#allocation7 + $0x150] sm:$0xff]  ;;  %s3413_s30 = smov 80   ;;  %v3494_v11 = vld [vmem:[#allocation7 + $0x140] sm:$0xff]  ;;  %s3414_s8 = smov 72   ;;  %vm3415_vm1 = vmmov 0  }
  0x42   :  { %2614 = vmatprep.subr.mxu1 %v91_v5  ;;  %2334 = vmatmul.mubr.msk.f32.vlgmr.msra.gmra.mxu0 %vm185_vm0, %v141_v1  ;;  %v3497_v12 = vld [vmem:[#allocation7 + $0x138] sm:$0xff]  ;;  %v3500_v13 = vld [vmem:[#allocation7 + $0x128] sm:$0xff]  ;;  %v3503_v14 = vld [vmem:[#allocation7 + $0x120] sm:$0xff]  ;;  %v3733_v62 = vshrl.u32 %v158_v61, 7 }
  0x43   :  { %448 = vmatprep.subr.mxu0 %v3474_v4  ;;  %145 = vrot.lane.b32.xlu0 %v141_v1, %s3410_s4  ;;  %v3506_v15 = vld [vmem:[#allocation7 + $0x110] sm:$0xff]  ;;  %v3509_v16 = vld [vmem:[#allocation7 + $0x108] sm:$0xff]  ;;  %v3512_v17 = vld [vmem:[#allocation7 + $0xf8] sm:$0xff] }
  0x44   :  { %149 = vrot.lane.b32.xlu1 %v141_v1, %s3411_s28  ;;  %449 = vmatpush1.msra.mxu0 %v3477_v6  ;;  %v3515_v18 = vld [vmem:[#allocation7 + $0xf0] sm:$0xff]  ;;  %v3518_v19 = vld [vmem:[#allocation7 + $0xe0] sm:$0xff]  ;;  %v3521_v20 = vld [vmem:[#allocation7 + $0xd8] sm:$0xff]  ;;  %v168_v63 = vsub.s32 4, %v3733_v62 }
  0x45   :  { %272 = vmatprep.mubr.f32.mxu0 %v4457_v0  ;;  %450 = vmatprep.subr.mxu0 %v3481_v7  ;;  %v3524_v21 = vld [vmem:[#allocation7 + $0xc8] sm:$0xff]  ;;  %v3527_v22 = vld [vmem:[#allocation7 + $0xc0] sm:$0xff]  ;;  %v3530_v23 = vld [vmem:[#allocation7 + $0xb0] sm:$0xff] }
  0x46   :  { %2615 = vmatpush3.msra.mxu1 %v91_v5  ;;  %451 = vmatpush1.msra.mxu0 %v3483_v8  ;;  %v3533_v24 = vld [vmem:[#allocation7 + $0xa8] sm:$0xff]  ;;  %v3536_v25 = vld [vmem:[#allocation7 + $0x98] sm:$0xff]  ;;  %v3539_v26 = vld [vmem:[#allocation7 + $0x90] sm:$0xff]  ;;  %v160_v5 = vsub.s32 0, %v3733_v62 }
  0x47   :  { %2628 = vmatprep.subr.mxu1 %v4457_v0  ;;  %151 = vrot.lane.b32.xlu0 %v141_v1, %s3412_s29  ;;  %v3542_v27 = vld [vmem:[#allocation7 + $0x80] sm:$0xff]  ;;  %v3545_v28 = vld [vmem:[#allocation7 + $0x78] sm:$0xff]  ;;  %v3548_v29 = vld [vmem:[#allocation7 + $0x68] sm:$0xff] }
  0x48   :  { %153 = vrot.lane.b32.xlu1 %v141_v1, %s3413_s30  ;;  %452 = vmatprep.subr.mxu0 %v3488_v9  ;;  %v3551_v30 = vld [vmem:[#allocation7 + $0x60] sm:$0xff]  ;;  %v3554_v31 = vld [vmem:[#allocation7 + $0x50] sm:$0xff]  ;;  %v3557_v32 = vld [vmem:[#allocation7 + $0x48] sm:$0xff] }
  0x49   :  { %453 = vmatpush1.msra.mxu0 %v3491_v10  ;;  %4506 = vst [vmem:[#allocation20_spill] sm:$0xff] %v3554_v31  ;;  %4507 = vst [vmem:[#allocation21_spill] sm:$0xff] %v3557_v32  ;;  %v3560_v33 = vld [vmem:[#allocation7 + $0x38] sm:$0xff]  ;;  %v3563_v34 = vld [vmem:[#allocation7 + $0x30] sm:$0xff] }
  0x4a   :  { %454 = vmatprep.subr.mxu0 %v3494_v11  ;;  %4508 = vst [vmem:[#allocation22_spill] sm:$0xff] %v3560_v33  ;;  %4509 = vst [vmem:[#allocation23_spill] sm:$0xff] %v3563_v34  ;;  %v3566_v35 = vld [vmem:[#allocation7 + $0x20] sm:$0xff]  ;;  %v3569_v36 = vld [vmem:[#allocation7 + $0x18] sm:$0xff] }
  0x4b   :  { %155 = vrot.lane.b32.xlu0 %v141_v1, %s3414_s8  ;;  %455 = vmatpush1.msra.mxu0 %v3497_v12  ;;  %4510 = vst [vmem:[#allocation24_spill] sm:$0xff] %v3566_v35  ;;  %4511 = vst [vmem:[#allocation25_spill] sm:$0xff] %v3569_v36  ;;  %v3575_v37 = vld [vmem:[#allocation7 + $0x190] sm:$0xff]  ;;  %v3579_v40 = vld [vmem:[#allocation7 + $0x178] sm:$0xff] }
  0x4c   :  { %456 = vmatprep.subr.mxu0 %v3500_v13  ;;  %v3587_v43 = vld [vmem:[#allocation7 + $0x160] sm:$0xff]  ;;  %v3594_v46 = vld [vmem:[#allocation7 + $0x148] sm:$0xff]  ;;  %v3600_v47 = vld [vmem:[#allocation7 + $0x130] sm:$0xff] }
  0x4d   :  { %457 = vmatpush1.msra.mxu0 %v3503_v14  ;;  %v3607_v49 = vld [vmem:[#allocation7 + $0x118] sm:$0xff]  ;;  %v3612_v50 = vld [vmem:[#allocation7 + $0x100] sm:$0xff]  ;;  %v3619_v51 = vld [vmem:[#allocation7 + $0xe8] sm:$0xff] }
  0x4e   :  { %458 = vmatprep.subr.mxu0 %v3506_v15  ;;  %v3624_v52 = vld [vmem:[#allocation7 + $0xd0] sm:$0xff]  ;;  %v3629_v53 = vld [vmem:[#allocation7 + $0xb8] sm:$0xff]  ;;  %v3634_v54 = vld [vmem:[#allocation7 + $0xa0] sm:$0xff] }
  0x4f   :  { %459 = vmatpush1.msra.mxu0 %v3509_v16  ;;  %v3639_v55 = vld [vmem:[#allocation7 + $0x88] sm:$0xff]  ;;  %v3642_v56 = vld [vmem:[#allocation5] sm:$0xff]  ;;  %v3646_v57 = vld [vmem:[#allocation7 + $0x70] sm:$0xff] }
  0x50   :  { %460 = vmatprep.subr.mxu0 %v3512_v17  ;;  %4512 = vst [vmem:[#allocation26_spill] sm:$0xff] %v3646_v57  ;;  %v3651_v58 = vld [vmem:[#allocation7 + $0x58] sm:$0xff]  ;;  %v3656_v59 = vld [vmem:[#allocation7 + $0x40] sm:$0xff]  ;;  %v3662_v60 = vld [vmem:[#allocation7 + $0x28] sm:$0xff] }
  0x51   :  { %461 = vmatpush1.msra.mxu0 %v3515_v18  ;;  %4513 = vst [vmem:[#allocation27_spill] sm:$0xff] %v3651_v58  ;;  %4514 = vst [vmem:[#allocation28_spill] sm:$0xff] %v3656_v59  ;;  %v3736_v1 = vld [vmem:[#allocation8] sm:$0x3f] }
  0x52   :  { %462 = vmatprep.subr.mxu0 %v3518_v19  ;;  %4515 = vst [vmem:[#allocation29_spill] sm:$0xff] %v3662_v60  ;;  %v169_v2 = vrot.slane %v3736_v1, %v168_v63 }
  0x53   :  { %463 = vmatpush1.msra.mxu0 %v3521_v20 }
  0x54   :  { %464 = vmatprep.subr.mxu0 %v3524_v21 }
  0x55   :  { %465 = vmatpush1.msra.mxu0 %v3527_v22 }
  0x56   :  { %466 = vmatprep.subr.mxu0 %v3530_v23 }
  0x57   :  { %467 = vmatpush1.msra.mxu0 %v3533_v24 }
  0x58   :  { %468 = vmatprep.subr.mxu0 %v3536_v25 }
  0x59   :  { %469 = vmatpush1.msra.mxu0 %v3539_v26 }
  0x5a   :  { %470 = vmatprep.subr.mxu0 %v3542_v27 }
  0x5b   :  { %471 = vmatpush1.msra.mxu0 %v3545_v28 }
  0x5c   :  { %472 = vmatprep.subr.mxu0 %v3548_v29 }
  0x5d   :  { %473 = vmatpush1.msra.mxu0 %v3551_v30 }
  0x5e   :  { %474 = vmatprep.subr.mxu0 %v3554_v31 }
  0x5f   :  { %475 = vmatpush1.msra.mxu0 %v3557_v32 }
  0x60   :  { %476 = vmatprep.subr.mxu0 %v3560_v33 }
  0x61   :  { %477 = vmatpush1.msra.mxu0 %v3563_v34 }
  0x62   :  { %478 = vmatprep.subr.mxu0 %v3566_v35 }
  0x63   :  { %479 = vmatpush1.msra.mxu0 %v3569_v36 }
  0x64   :  { %610 = vmatprep.subr.mxu0 %v3474_v4 }
  0xb1   :  { %v144_v38 = vpop.permute.xlu0 %143 }
  0xb2   :  { %v148_v39 = vpop.permute.xlu1 %147  ;;  %2335 = vmatmul.mubr.msk.f32.gmra.mxu0 %vm185_vm0, %v144_v38  ;;  %2617 = vmatmul.mubr.msk.f32.vlgmr.msra.gmra.mxu1 %vm185_vm0, %v144_v38  ;;  %v3740_v38 = vrot.slane %v169_v2, %v160_v5 }
  0xb3   :  { %278 = vmatprep.mubr.f32.mxu0 %v4457_v0  ;;  %2629 = vmatpush3.msra.mxu1 %v3575_v37 }
  0xb4   :  { %2630 = vmatprep.subr.mxu1 %v4457_v0 }
  0xb5   :  { %v146_v41 = vpop.permute.xlu0 %145  ;;  %2631 = vmatpush3.msra.mxu1 %v3579_v40 }
  0xb6   :  { %v150_v42 = vpop.permute.xlu1 %149  ;;  %2336 = vmatmul.mubr.msk.f32.gmra.mxu0 %vm185_vm0, %v146_v41  ;;  %2619 = vmatprep.mubr.msk.f32.mxu1 %vm185_vm0, %v146_v41 }
  0xb7   :  { %2620 = vmatmul.mubr.msk.f32.gmra.mxu1 %vm185_vm0, %v148_v39  ;;  %284 = vmatprep.mubr.f32.mxu0 %v4457_v0 }
  0xb8   :  { %2622 = vmatprep.mubr.msk.f32.mxu1 %vm185_vm0, %v150_v42  ;;  %2632 = vmatprep.subr.mxu1 %v4457_v0 }
  0xb9   :  { %v152_v44 = vpop.permute.xlu0 %151  ;;  %2633 = vmatpush3.msra.mxu1 %v3587_v43 }
  0xba   :  { %v154_v45 = vpop.permute.xlu1 %153  ;;  %2337 = vmatmul.mubr.msk.f32.gmra.mxu0 %vm185_vm0, %v148_v39  ;;  %2634 = vmatprep.subr.mxu1 %v4457_v0 }
  0xbb   :  { %290 = vmatprep.mubr.f32.mxu0 %v4457_v0  ;;  %2623 = vmatmul.mubr.msk.f32.gmra.mxu1 %vm185_vm0, %v152_v44 }
  0xbc   :  { %2625 = vmatprep.mubr.msk.f32.mxu1 %vm185_vm0, %v154_v45  ;;  %2635 = vmatpush3.msra.mxu1 %v3594_v46 }
  0xbd   :  { %v156_v48 = vpop.permute.xlu0 %155  ;;  %2636 = vmatprep.subr.mxu1 %v4457_v0 }
  0xbe   :  { %2338 = vmatmul.mubr.msk.f32.gmra.mxu0 %vm185_vm0, %v150_v42  ;;  %2637 = vmatpush3.msra.mxu1 %v3600_v47 }
  0xbf   :  { %296 = vmatprep.mubr.f32.mxu0 %v4457_v0  ;;  %2626 = vmatmul.mubr.msk.f32.gmra.mxu1 %vm185_vm0, %v156_v48 }
  0xc0   :  { %2638 = vmatprep.subr.mxu1 %v4457_v0  ;;  %2660 = vmatprep.mubr.msk.f32.mxu1 %vm3415_vm1, %v4457_v0 }
  0xc1   :  { %2639 = vmatpush3.msra.mxu1 %v3607_v49 }
  0xc2   :  { %2339 = vmatmul.mubr.msk.f32.gmra.mxu0 %vm185_vm0, %v152_v44  ;;  %2640 = vmatprep.subr.mxu1 %v4457_v0 }
  0xc3   :  { %302 = vmatprep.mubr.f32.mxu0 %v4457_v0  ;;  %2641 = vmatpush3.msra.mxu1 %v3612_v50 }
  0xc4   :  { %2642 = vmatprep.subr.mxu1 %v4457_v0 }
  0xc5   :  { %2643 = vmatpush3.msra.mxu1 %v3619_v51 }
  0xc6   :  { %2340 = vmatmul.mubr.msk.f32.gmra.mxu0 %vm185_vm0, %v154_v45  ;;  %2644 = vmatprep.subr.mxu1 %v4457_v0 }
  0xc7   :  { %308 = vmatprep.mubr.f32.mxu0 %v4457_v0  ;;  %2645 = vmatpush3.msra.mxu1 %v3624_v52 }
  0xc8   :  { %2646 = vmatprep.subr.mxu1 %v4457_v0 }
  0xc9   :  { %2647 = vmatpush3.msra.mxu1 %v3629_v53 }
  0xca   :  { %2341 = vmatmul.mubr.msk.f32.gmra.mxu0 %vm185_vm0, %v156_v48  ;;  %2648 = vmatprep.subr.mxu1 %v4457_v0 }
  0xcb   :  { %512 = vmatprep.mubr.f32.mxu0 %v4457_v0  ;;  %2649 = vmatpush3.msra.mxu1 %v3634_v54 }
  0xcc   :  { %2650 = vmatprep.subr.mxu1 %v4457_v0 }
  0xcd   :  { %2651 = vmatpush3.msra.mxu1 %v3639_v55 }
  0xce   :  { %513 = vmatmul.mubr.f32.vlgmr.msra.gmra.mxu0 %v3642_v56  ;;  %2652 = vmatprep.subr.mxu1 %v4457_v0 }
  0xcf   :  { %2653 = vmatpush3.msra.mxu1 %v3646_v57  ;;  %611 = vmatpush1.msra.mxu0 %v3477_v6 }
  0xd0   :  { %2654 = vmatprep.subr.mxu1 %v4457_v0  ;;  %612 = vmatprep.subr.mxu0 %v3481_v7 }
  0xd1   :  { %2655 = vmatpush3.msra.mxu1 %v3651_v58  ;;  %613 = vmatpush1.msra.mxu0 %v3483_v8 }
  0xd2   :  { %2656 = vmatprep.subr.mxu1 %v4457_v0  ;;  %614 = vmatprep.subr.mxu0 %v3488_v9 }
  0xd3   :  { %2657 = vmatpush3.msra.mxu1 %v3656_v59  ;;  %615 = vmatpush1.msra.mxu0 %v3491_v10 }
  0xd4   :  { %2658 = vmatprep.subr.mxu1 %v4457_v0  ;;  %616 = vmatprep.subr.mxu0 %v3494_v11 }
  0xd5   :  { %2659 = vmatpush3.msra.mxu1 %v3662_v60  ;;  %617 = vmatpush1.msra.mxu0 %v3497_v12 }
  0xd6   :  { %2661 = vmatmul.mubr.f32.vlgmr.msra.gmra.mxu1 %v3642_v56  ;;  %2663 = vmatprep.subr.mxu1 %v4457_v0 }
  0xd7   :  { %2664 = vmatpush3.msra.mxu1 %v3575_v37  ;;  %618 = vmatprep.subr.mxu0 %v3500_v13 }
  0xd8   :  { %2665 = vmatprep.subr.mxu1 %v4457_v0  ;;  %619 = vmatpush1.msra.mxu0 %v3503_v14 }
  0xd9   :  { %2666 = vmatpush3.msra.mxu1 %v3579_v40  ;;  %620 = vmatprep.subr.mxu0 %v3506_v15 }
  0xda   :  { %2667 = vmatprep.subr.mxu1 %v4457_v0  ;;  %621 = vmatpush1.msra.mxu0 %v3509_v16 }
  0xdb   :  { %2668 = vmatpush3.msra.mxu1 %v3587_v43  ;;  %622 = vmatprep.subr.mxu0 %v3512_v17 }
  0xdc   :  { %2669 = vmatprep.subr.mxu1 %v4457_v0  ;;  %623 = vmatpush1.msra.mxu0 %v3515_v18 }
  0xdd   :  { %2670 = vmatpush3.msra.mxu1 %v3594_v46  ;;  %624 = vmatprep.subr.mxu0 %v3518_v19 }
  0xde   :  { %2671 = vmatprep.subr.mxu1 %v4457_v0  ;;  %625 = vmatpush1.msra.mxu0 %v3521_v20 }
  0xdf   :  { %2672 = vmatpush3.msra.mxu1 %v3600_v47  ;;  %626 = vmatprep.subr.mxu0 %v3524_v21 }
  0xe0   :  { %2673 = vmatprep.subr.mxu1 %v4457_v0  ;;  %627 = vmatpush1.msra.mxu0 %v3527_v22 }
  0xe1   :  { %2674 = vmatpush3.msra.mxu1 %v3607_v49  ;;  %628 = vmatprep.subr.mxu0 %v3530_v23 }
  0xe2   :  { %2675 = vmatprep.subr.mxu1 %v4457_v0  ;;  %629 = vmatpush1.msra.mxu0 %v3533_v24 }
  0xe3   :  { %2676 = vmatpush3.msra.mxu1 %v3612_v50  ;;  %630 = vmatprep.subr.mxu0 %v3536_v25 }
  0xe4   :  { %2677 = vmatprep.subr.mxu1 %v4457_v0  ;;  %631 = vmatpush1.msra.mxu0 %v3539_v26 }
  0xe5   :  { %2678 = vmatpush3.msra.mxu1 %v3619_v51  ;;  %632 = vmatprep.subr.mxu0 %v3542_v27 }
  0xe6   :  { %2679 = vmatprep.subr.mxu1 %v4457_v0  ;;  %633 = vmatpush1.msra.mxu0 %v3545_v28 }
  0xe7   :  { %2680 = vmatpush3.msra.mxu1 %v3624_v52  ;;  %634 = vmatprep.subr.mxu0 %v3548_v29 }
  0xe8   :  { %2681 = vmatprep.subr.mxu1 %v4457_v0  ;;  %635 = vmatpush1.msra.mxu0 %v3551_v30 }
  0xe9   :  { %2682 = vmatpush3.msra.mxu1 %v3629_v53  ;;  %636 = vmatprep.subr.mxu0 %v3554_v31 }
  0xea   :  { %2683 = vmatprep.subr.mxu1 %v4457_v0  ;;  %637 = vmatpush1.msra.mxu0 %v3557_v32 }
  0xeb   :  { %2684 = vmatpush3.msra.mxu1 %v3634_v54  ;;  %638 = vmatprep.subr.mxu0 %v3560_v33 }
  0xec   :  { %2685 = vmatprep.subr.mxu1 %v4457_v0  ;;  %639 = vmatpush1.msra.mxu0 %v3563_v34 }
  0xed   :  { %2686 = vmatpush3.msra.mxu1 %v3639_v55  ;;  %640 = vmatprep.subr.mxu0 %v3566_v35 }
  0xee   :  { %2687 = vmatprep.subr.mxu1 %v4457_v0  ;;  %641 = vmatpush1.msra.mxu0 %v3569_v36 }
  0xef   :  { %2688 = vmatpush3.msra.mxu1 %v3646_v57  ;;  %674 = vmatprep.mubr.f32.mxu0 %v4457_v0 }
  0xf0   :  { %2689 = vmatprep.subr.mxu1 %v4457_v0  ;;  %2695 = vmatprep.mubr.msk.f32.mxu1 %vm3415_vm1, %v4457_v0 }
  0xf1   :  { %2690 = vmatpush3.msra.mxu1 %v3651_v58  ;;  %772 = vmatprep.subr.mxu0 %v3474_v4 }
  0xf2   :  { %2691 = vmatprep.subr.mxu1 %v4457_v0 }
  0xf3   :  { %2692 = vmatpush3.msra.mxu1 %v3656_v59 }
  0xf4   :  { %2693 = vmatprep.subr.mxu1 %v4457_v0 }
  0xf5   :  { %2694 = vmatpush3.msra.mxu1 %v3662_v60 }
  0xf6   :  { %2698 = vmatprep.subr.mxu1 %v4457_v0 }
 0x102   :  { %v268_v3 = vpop.f32.mrf.mxu0 }
 0x104   :  { %v270_v39 = vpop.f32.mrf.mxu0 }
 0x172   :  { %v3742_v41 = vpop.f32.mrf.mxu0  ;;  %v2618_v42 = vpop.f32.mrf.mxu1 }
 0x173   :  { %4516 = vst [vmem:[#allocation30_spill] sm:$0xff] %v3742_v41  ;;  %v3745_v44 = vadd.f32 %v2618_v42, %v3740_v38 }
 0x174   :  { %v3747_v45 = vpop.f32.mrf.mxu0  ;;  %v381_v48 = vpop.f32.mrf.mxu1 }
 0x175   :  { %4517 = vst [vmem:[#allocation31_spill] sm:$0xff] %v3745_v44  ;;  %4518 = vst [vmem:[#allocation32_spill] sm:$0xff] %v3747_v45 }
 0x176   :  { %v3749_v61 = vpop.f32.mrf.mxu0 }
 0x177   :  { %4519 = vst [vmem:[#allocation33_spill] sm:$0xff] %v3749_v61  ;;  %v2621_v0 = vpop.f32.mrf.mxu1 }
 0x178   :  { %v3751_v4 = vpop.f32.mrf.mxu0  ;;  %v3754_v63 = vadd.f32 %v2621_v0, %v3740_v38 }
 0x179   :  { %4520 = vst [vmem:[#allocation34_spill] sm:$0xff] %v3751_v4  ;;  %v391_v2 = vpop.f32.mrf.mxu1 }
 0x17a   :  { %4521 = vst [vmem:[#allocation35_spill] sm:$0xff] %v3754_v63  ;;  %v3756_v60 = vpop.f32.mrf.mxu0  ;;  %v3759_v41 = vadd.f32 %v391_v2, %v3740_v38 }
 0x17b   :  { %4522 = vst [vmem:[#allocation36_spill] sm:$0xff] %v3756_v60  ;;  %v2624_v36 = vpop.f32.mrf.mxu1 }
 0x17c   :  { %4523 = vst [vmem:[#allocation37_spill] sm:$0xff] %v3759_v41  ;;  %v3761_v42 = vpop.f32.mrf.mxu0  ;;  %v3764_v44 = vadd.f32 %v2624_v36, %v3740_v38  ;;  %v423_v36 = vsub.s32 1, %v3733_v62 }
 0x17d   :  { %4524 = vst [vmem:[#allocation38_spill] sm:$0xff] %v3761_v42  ;;  %v401_v45 = vpop.f32.mrf.mxu1 }
 0x17e   :  { %4525 = vst [vmem:[#allocation39_spill] sm:$0xff] %v3764_v44  ;;  %v3766_v61 = vpop.f32.mrf.mxu0  ;;  %v3769_v4 = vadd.f32 %v401_v45, %v3740_v38  ;;  %v161_v45 = vrot.slane %v3736_v1, %v160_v5 }
 0x17f   :  { %4526 = vst [vmem:[#allocation40_spill] sm:$0xff] %v3766_v61  ;;  %v2627_v0 = vpop.f32.mrf.mxu1 }
 0x180   :  { %4527 = vst [vmem:[#allocation41_spill] sm:$0xff] %v3769_v4  ;;  %v3771_v63 = vpop.f32.mrf.mxu0  ;;  %v3774_v60 = vadd.f32 %v2627_v0, %v3740_v38  ;;  %v424_v4 = vrot.slane %v3736_v1, %v423_v36 }
 0x181   :  { %4528 = vst [vmem:[#allocation42_spill] sm:$0xff] %v3771_v63  ;;  %v411_v2 = vpop.f32.mrf.mxu1  ;;  %v427_v63 = vsub.s32 3, %v3733_v62 }
 0x182   :  { %4529 = vst [vmem:[#allocation43_spill] sm:$0xff] %v3774_v60  ;;  %v3776_v41 = vpop.f32.mrf.mxu0  ;;  %v3779_v42 = vadd.f32 %v411_v2, %v3740_v38  ;;  %v164_v60 = vsub.s32 2, %v3733_v62  ;;  %v3794_v2 = vrot.slane %v161_v45, %v160_v5 }
 0x183   :  { %4530 = vst [vmem:[#allocation44_spill] sm:$0xff] %v3776_v41 }
 0x184   :  { %4531 = vst [vmem:[#allocation45_spill] sm:$0xff] %v3779_v42  ;;  %v3782_v44 = vpop.f32.mrf.mxu0  ;;  %4536 = vst [vmem:[#allocation50_spill] sm:$0xff] %v3794_v2  ;;  %v3796_v42 = vrot.slane %v424_v4, %v423_v36  ;;  %v269_v34 = vadd.f32 %v268_v3, %v3794_v2 }
 0x185   :  { %4532 = vst [vmem:[#allocation46_spill] sm:$0xff] %v3782_v44  ;;  %v428_v44 = vrot.slane %v3736_v1, %v427_v63 }
 0x186   :  { %v3784_v61 = vpop.f32.mrf.mxu0  ;;  %4537 = vst [vmem:[#allocation51_spill] sm:$0xff] %v3796_v42 }
 0x187   :  { %4533 = vst [vmem:[#allocation47_spill] sm:$0xff] %v3784_v61  ;;  %v165_v61 = vrot.slane %v3736_v1, %v164_v60 }
 0x188   :  { %v3789_v0 = vpop.f32.mrf.mxu0 }
 0x189   :  { %4534 = vst [vmem:[#allocation48_spill] sm:$0xff] %v3789_v0  ;;  %v3804_v0 = vrot.slane %v428_v44, %v423_v36  ;;  %v3806_v32 = vrot.slane %v165_v61, %v160_v5 }
 0x18a   :  { %v3792_v41 = vpop.f32.mrf.mxu0 }
 0x18b   :  { %4535 = vst [vmem:[#allocation49_spill] sm:$0xff] %v3792_v41  ;;  %v271_v63 = vadd.f32 %v270_v39, %v3806_v32 }
 0x18c   :  { %v3799_v35 = vpop.f32.mrf.mxu0 }
 0x18d   :  { %4538 = vst [vmem:[#allocation52_spill] sm:$0xff] %v3799_v35 }
 0x18e   :  { %v514_v59 = vpop.f32.mrf.mxu0 }
 0x18f   :  { %v515_v33 = vadd.f32 %v514_v59, %v3796_v42  ;;  %v431_v59 = vsub.s32 5, %v3733_v62 }
 0x190   :  { %v516_v58 = vpop.f32.mrf.mxu0 }
 0x191   :  { %v589_v45 = vadd.f32 %v515_v33, %v269_v34  ;;  %v517_v4 = vadd.f32 %v516_v58, %v3804_v0  ;;  %v432_v5 = vrot.slane %v3736_v1, %v431_v59  ;;  %v4548_v59 = vld [vmem:[#allocation24_spill] sm:$0xff] }
 0x193   :  { %v2350_v41 = vmul.f32 -1.442695, %v589_v45  ;;  %v596_v31 = vadd.f32 %v517_v4, %v271_v63  ;;  %v3812_v44 = vrot.slane %v432_v5, %v423_v36  ;;  %v4544_v36 = vld [vmem:[#allocation27_spill] sm:$0xff]  ;;  %v4545_v63 = vld [vmem:[#allocation22_spill] sm:$0xff]  ;;  %v4549_v5 = vld [vmem:[#allocation25_spill] sm:$0xff] }
 0x195   :  { %3104 = vpow2.f32 %v2350_v41  ;;  %v2351_v57 = vmul.f32 -1.442695, %v596_v31  ;;  %v382_v41 = vadd.f32 %v381_v48, %v3740_v38  ;;  %v4542_v38 = vld [vmem:[#allocation20_spill] sm:$0xff]  ;;  %v4543_v48 = vld [vmem:[#allocation21_spill] sm:$0xff] }
 0x196   :  { %v585_v35 = vpop.f32.mrf.mxu1 }
 0x197   :  { %3106 = vpow2.f32 %v2351_v57  ;;  %v586_v58 = vadd.f32 %v585_v35, %v3812_v44  ;;  %v4540_v35 = vmov 0.0  }
 0x198   :  { %v2662_v60 = vpop.f32.mrf.mxu1 }
 0x199   :  { %v4546_v60 = vld [vmem:[#allocation23_spill] sm:$0xff] }
 0x1a2   :  { %v3105_v3 = vpop.eup %3104 }
 0x1a3   :  { %v593_v2 = vadd.f32 1.0, %v3105_v3  ;;  %v4547_v3 = vld [vmem:[#allocation28_spill] sm:$0xff] }
 0x1a4   :  { %v3107_v33 = vpop.eup %3106 }
 0x1a5   :  { %3108 = vrcp.f32 %v593_v2  ;;  %v600_v34 = vadd.f32 1.0, %v3107_v33  ;;  %v4550_v33 = vld [vmem:[#allocation29_spill] sm:$0xff] }
 0x1a7   :  { %3110 = vrcp.f32 %v600_v34  ;;  %v4551_v34 = vld [vmem:[#allocation19_spill] sm:$0xff] }
 0x1b2   :  { %v3109_v39 = vpop.eup %3108 }
 0x1b3   :  { %v603_v61 = vmul.f32 %v3109_v39, %v586_v58 }
 0x1b4   :  { %v3111_v57 = vpop.eup %3110 }
 0x1b5   :  { %v604_v31 = vadd.f32 %v603_v61, %v382_v41  ;;  %v606_v45 = vsub.f32 1.0, %v3111_v57  ;;  %v608_v2 = vmul.f32 %v3111_v57, %v3642_v56  ;;  %v4541_v56 = vld [vmem:[#allocation26_spill] sm:$0xff] }
 0x1b6   :  { %v4552_v41 = vld [vmem:[#allocation50_spill] sm:$0xff] }
 0x1b7   :  { %3112 = vtanh.f32 %v604_v31  ;;  %v4553_v61 = vld [vmem:[#allocation30_spill] sm:$0xff] }
 0x1b8   :  { %v275_v31 = vadd.f32 %v4553_v61, %v4552_v41 }
 0x1c4   :  { %v3113_v4 = vpop.eup %3112 }
 0x1c5   :  { %v607_v62 = vmul.f32 %v3113_v4, %v606_v45 }
 0x1c7   :  { %v3817_v1 = vadd.f32 %v608_v2, %v607_v62 }
 0x1c9   :  { %4539 = vst [vmem:[#allocation53_spill] sm:$0xff] %v3817_v1  ;;  %675 = vmatmul.mubr.f32.vlgmr.msra.gmra.mxu0 %v3817_v1  ;;  %2696 = vmatmul.mubr.f32.vlgmr.msra.gmra.mxu1 %v3817_v1 }
 0x1ca   :  { %773 = vmatpush1.msra.mxu0 %v3477_v6  ;;  %2699 = vmatpush3.msra.mxu1 %v3575_v37 }
 0x1cb   :  { %774 = vmatprep.subr.mxu0 %v3481_v7  ;;  %2700 = vmatprep.subr.mxu1 %v4540_v35 }
 0x1cc   :  { %775 = vmatpush1.msra.mxu0 %v3483_v8  ;;  %2701 = vmatpush3.msra.mxu1 %v3579_v40 }
 0x1cd   :  { %776 = vmatprep.subr.mxu0 %v3488_v9  ;;  %2702 = vmatprep.subr.mxu1 %v4540_v35 }
 0x1ce   :  { %777 = vmatpush1.msra.mxu0 %v3491_v10  ;;  %2703 = vmatpush3.msra.mxu1 %v3587_v43 }
 0x1cf   :  { %778 = vmatprep.subr.mxu0 %v3494_v11  ;;  %2704 = vmatprep.subr.mxu1 %v4540_v35 }
 0x1d0   :  { %779 = vmatpush1.msra.mxu0 %v3497_v12  ;;  %2705 = vmatpush3.msra.mxu1 %v3594_v46 }
 0x1d1   :  { %780 = vmatprep.subr.mxu0 %v3500_v13  ;;  %2706 = vmatprep.subr.mxu1 %v4540_v35 }
 0x1d2   :  { %781 = vmatpush1.msra.mxu0 %v3503_v14  ;;  %2707 = vmatpush3.msra.mxu1 %v3600_v47 }
 0x1d3   :  { %782 = vmatprep.subr.mxu0 %v3506_v15  ;;  %2708 = vmatprep.subr.mxu1 %v4540_v35 }
 0x1d4   :  { %783 = vmatpush1.msra.mxu0 %v3509_v16  ;;  %2709 = vmatpush3.msra.mxu1 %v3607_v49 }
 0x1d5   :  { %784 = vmatprep.subr.mxu0 %v3512_v17  ;;  %2710 = vmatprep.subr.mxu1 %v4540_v35 }
 0x1d6   :  { %785 = vmatpush1.msra.mxu0 %v3515_v18  ;;  %2711 = vmatpush3.msra.mxu1 %v3612_v50 }
 0x1d7   :  { %786 = vmatprep.subr.mxu0 %v3518_v19  ;;  %2712 = vmatprep.subr.mxu1 %v4540_v35 }
 0x1d8   :  { %787 = vmatpush1.msra.mxu0 %v3521_v20  ;;  %2713 = vmatpush3.msra.mxu1 %v3619_v51 }
 0x1d9   :  { %788 = vmatprep.subr.mxu0 %v3524_v21  ;;  %2714 = vmatprep.subr.mxu1 %v4540_v35 }
 0x1da   :  { %789 = vmatpush1.msra.mxu0 %v3527_v22  ;;  %2715 = vmatpush3.msra.mxu1 %v3624_v52 }
 0x1db   :  { %790 = vmatprep.subr.mxu0 %v3530_v23  ;;  %2716 = vmatprep.subr.mxu1 %v4540_v35 }
 0x1dc   :  { %791 = vmatpush1.msra.mxu0 %v3533_v24  ;;  %2717 = vmatpush3.msra.mxu1 %v3629_v53 }
 0x1dd   :  { %792 = vmatprep.subr.mxu0 %v3536_v25  ;;  %2718 = vmatprep.subr.mxu1 %v4540_v35 }
 0x1de   :  { %793 = vmatpush1.msra.mxu0 %v3539_v26  ;;  %2719 = vmatpush3.msra.mxu1 %v3634_v54 }
 0x1df   :  { %794 = vmatprep.subr.mxu0 %v3542_v27  ;;  %2720 = vmatprep.subr.mxu1 %v4540_v35 }
 0x1e0   :  { %795 = vmatpush1.msra.mxu0 %v3545_v28  ;;  %2721 = vmatpush3.msra.mxu1 %v3639_v55 }
 0x1e1   :  { %796 = vmatprep.subr.mxu0 %v3548_v29  ;;  %2722 = vmatprep.subr.mxu1 %v4540_v35 }
 0x1e2   :  { %797 = vmatpush1.msra.mxu0 %v3551_v30  ;;  %2723 = vmatpush3.msra.mxu1 %v4541_v56 }
 0x1e3   :  { %798 = vmatprep.subr.mxu0 %v4542_v38  ;;  %2724 = vmatprep.subr.mxu1 %v4540_v35 }
 0x1e4   :  { %799 = vmatpush1.msra.mxu0 %v4543_v48  ;;  %2725 = vmatpush3.msra.mxu1 %v4544_v36 }
 0x1e5   :  { %800 = vmatprep.subr.mxu0 %v4545_v63  ;;  %2726 = vmatprep.subr.mxu1 %v4540_v35 }
 0x1e6   :  { %801 = vmatpush1.msra.mxu0 %v4546_v60  ;;  %2727 = vmatpush3.msra.mxu1 %v4547_v3 }
 0x1e7   :  { %802 = vmatprep.subr.mxu0 %v4548_v59  ;;  %2728 = vmatprep.subr.mxu1 %v4540_v35 }
 0x1e8   :  { %803 = vmatpush1.msra.mxu0 %v4549_v5  ;;  %836 = vmatprep.mubr.f32.mxu0 %v4540_v35  ;;  %v4554_v5 = vld [vmem:[#allocation32_spill] sm:$0xff] }
 0x1e9   :  { %2729 = vmatpush3.msra.mxu1 %v4550_v33  ;;  %2730 = vmatprep.mubr.msk.f32.mxu1 %vm3415_vm1, %v4540_v35  ;;  %v277_v59 = vadd.f32 %v4554_v5, %v3806_v32 }
 0x1ea   :  { %934 = vmatprep.subr.mxu0 %v4551_v34  ;;  %2733 = vmatprep.subr.mxu1 %v4540_v35 }
 0x289   :  { %v676_v58 = vpop.f32.mrf.mxu0  ;;  %v747_v39 = vpop.f32.mrf.mxu1 }
 0x28a   :  { %v677_v57 = vadd.f32 %v676_v58, %v3796_v42  ;;  %v748_v58 = vadd.f32 %v747_v39, %v3812_v44  ;;  %v4563_v39 = vld [vmem:[#allocation29_spill] sm:$0xff] }
 0x28b   :  { %v678_v45 = vpop.f32.mrf.mxu0  ;;  %v2697_v4 = vpop.f32.mrf.mxu1 }
 0x28c   :  { %v751_v62 = vadd.f32 %v677_v57, %v275_v31  ;;  %v679_v33 = vadd.f32 %v678_v45, %v3804_v0  ;;  %v4555_v31 = vld [vmem:[#allocation31_spill] sm:$0xff] }
 0x28e   :  { %v2352_v2 = vmul.f32 -1.442695, %v751_v62  ;;  %v758_v34 = vadd.f32 %v679_v33, %v277_v59  ;;  %v4561_v33 = vld [vmem:[#allocation24_spill] sm:$0xff] }
 0x290   :  { %3114 = vpow2.f32 %v2352_v2  ;;  %v2353_v3 = vmul.f32 -1.442695, %v758_v34  ;;  %v4562_v34 = vld [vmem:[#allocation25_spill] sm:$0xff] }
 0x292   :  { %3116 = vpow2.f32 %v2353_v3 }
 0x29d   :  { %v3115_v60 = vpop.eup %3114 }
 0x29e   :  { %v755_v63 = vadd.f32 1.0, %v3115_v60  ;;  %v4560_v60 = vld [vmem:[#allocation28_spill] sm:$0xff] }
 0x29f   :  { %v3117_v36 = vpop.eup %3116 }
 0x2a0   :  { %3118 = vrcp.f32 %v755_v63  ;;  %v762_v61 = vadd.f32 1.0, %v3117_v36  ;;  %v4558_v36 = vld [vmem:[#allocation22_spill] sm:$0xff]  ;;  %v4559_v63 = vld [vmem:[#allocation23_spill] sm:$0xff] }
 0x2a2   :  { %3120 = vrcp.f32 %v762_v61  ;;  %v4564_v61 = vld [vmem:[#allocation19_spill] sm:$0xff] }
 0x2ad   :  { %v3119_v42 = vpop.eup %3118 }
 0x2ae   :  { %v765_v4 = vmul.f32 %v3119_v42, %v748_v58  ;;  %v4557_v42 = vld [vmem:[#allocation27_spill] sm:$0xff] }
 0x2af   :  { %v3121_v45 = vpop.eup %3120 }
 0x2b0   :  { %v766_v57 = vadd.f32 %v765_v4, %v4555_v31  ;;  %v768_v62 = vsub.f32 1.0, %v3121_v45  ;;  %v770_v59 = vmul.f32 %v3121_v45, %v3817_v1  ;;  %v4565_v31 = vld [vmem:[#allocation33_spill] sm:$0xff]  ;;  %v4566_v45 = vld [vmem:[#allocation51_spill] sm:$0xff] }
 0x2b2   :  { %3122 = vtanh.f32 %v766_v57  ;;  %v281_v57 = vadd.f32 %v4565_v31, %v4552_v41 }
 0x2bf   :  { %v3123_v5 = vpop.eup %3122 }
 0x2c0   :  { %v769_v2 = vmul.f32 %v3123_v5, %v768_v62 }
 0x2c2   :  { %v3897_v3 = vadd.f32 %v770_v59, %v769_v2 }
 0x2c4   :  { %4556 = vst [vmem:[#allocation26_spill] sm:$0xff] %v3897_v3  ;;  %837 = vmatmul.mubr.f32.vlgmr.msra.gmra.mxu0 %v3897_v3  ;;  %2731 = vmatmul.mubr.f32.vlgmr.msra.gmra.mxu1 %v3897_v3 }
 0x2c5   :  { %935 = vmatpush1.msra.mxu0 %v3477_v6  ;;  %2734 = vmatpush3.msra.mxu1 %v3575_v37 }
 0x2c6   :  { %936 = vmatprep.subr.mxu0 %v3481_v7  ;;  %2735 = vmatprep.subr.mxu1 %v4540_v35 }
 0x2c7   :  { %937 = vmatpush1.msra.mxu0 %v3483_v8  ;;  %2736 = vmatpush3.msra.mxu1 %v3579_v40 }
 0x2c8   :  { %938 = vmatprep.subr.mxu0 %v3488_v9  ;;  %2737 = vmatprep.subr.mxu1 %v4540_v35 }
 0x2c9   :  { %939 = vmatpush1.msra.mxu0 %v3491_v10  ;;  %2738 = vmatpush3.msra.mxu1 %v3587_v43 }
 0x2ca   :  { %940 = vmatprep.subr.mxu0 %v3494_v11  ;;  %2739 = vmatprep.subr.mxu1 %v4540_v35 }
 0x2cb   :  { %941 = vmatpush1.msra.mxu0 %v3497_v12  ;;  %2740 = vmatpush3.msra.mxu1 %v3594_v46 }
 0x2cc   :  { %942 = vmatprep.subr.mxu0 %v3500_v13  ;;  %2741 = vmatprep.subr.mxu1 %v4540_v35 }
 0x2cd   :  { %943 = vmatpush1.msra.mxu0 %v3503_v14  ;;  %2742 = vmatpush3.msra.mxu1 %v3600_v47 }
 0x2ce   :  { %944 = vmatprep.subr.mxu0 %v3506_v15  ;;  %2743 = vmatprep.subr.mxu1 %v4540_v35 }
 0x2cf   :  { %945 = vmatpush1.msra.mxu0 %v3509_v16  ;;  %2744 = vmatpush3.msra.mxu1 %v3607_v49 }
 0x2d0   :  { %946 = vmatprep.subr.mxu0 %v3512_v17  ;;  %2745 = vmatprep.subr.mxu1 %v4540_v35 }
 0x2d1   :  { %947 = vmatpush1.msra.mxu0 %v3515_v18  ;;  %2746 = vmatpush3.msra.mxu1 %v3612_v50 }
 0x2d2   :  { %948 = vmatprep.subr.mxu0 %v3518_v19  ;;  %2747 = vmatprep.subr.mxu1 %v4540_v35 }
 0x2d3   :  { %949 = vmatpush1.msra.mxu0 %v3521_v20  ;;  %2748 = vmatpush3.msra.mxu1 %v3619_v51 }
 0x2d4   :  { %950 = vmatprep.subr.mxu0 %v3524_v21  ;;  %2749 = vmatprep.subr.mxu1 %v4540_v35 }
 0x2d5   :  { %951 = vmatpush1.msra.mxu0 %v3527_v22  ;;  %2750 = vmatpush3.msra.mxu1 %v3624_v52 }
 0x2d6   :  { %952 = vmatprep.subr.mxu0 %v3530_v23  ;;  %2751 = vmatprep.subr.mxu1 %v4540_v35 }
 0x2d7   :  { %953 = vmatpush1.msra.mxu0 %v3533_v24  ;;  %2752 = vmatpush3.msra.mxu1 %v3629_v53 }
 0x2d8   :  { %954 = vmatprep.subr.mxu0 %v3536_v25  ;;  %2753 = vmatprep.subr.mxu1 %v4540_v35 }
 0x2d9   :  { %955 = vmatpush1.msra.mxu0 %v3539_v26  ;;  %2754 = vmatpush3.msra.mxu1 %v3634_v54 }
 0x2da   :  { %956 = vmatprep.subr.mxu0 %v3542_v27  ;;  %2755 = vmatprep.subr.mxu1 %v4540_v35 }
 0x2db   :  { %957 = vmatpush1.msra.mxu0 %v3545_v28  ;;  %2756 = vmatpush3.msra.mxu1 %v3639_v55 }
 0x2dc   :  { %958 = vmatprep.subr.mxu0 %v3548_v29  ;;  %2757 = vmatprep.subr.mxu1 %v4540_v35 }
 0x2dd   :  { %959 = vmatpush1.msra.mxu0 %v3551_v30  ;;  %2758 = vmatpush3.msra.mxu1 %v4541_v56 }
 0x2de   :  { %960 = vmatprep.subr.mxu0 %v4542_v38  ;;  %2759 = vmatprep.subr.mxu1 %v4540_v35 }
 0x2df   :  { %961 = vmatpush1.msra.mxu0 %v4543_v48  ;;  %2760 = vmatpush3.msra.mxu1 %v4557_v42 }
 0x2e0   :  { %962 = vmatprep.subr.mxu0 %v4558_v36  ;;  %2761 = vmatprep.subr.mxu1 %v4540_v35 }
 0x2e1   :  { %963 = vmatpush1.msra.mxu0 %v4559_v63  ;;  %2762 = vmatpush3.msra.mxu1 %v4560_v60 }
 0x2e2   :  { %964 = vmatprep.subr.mxu0 %v4561_v33  ;;  %2763 = vmatprep.subr.mxu1 %v4540_v35 }
 0x2e3   :  { %965 = vmatpush1.msra.mxu0 %v4562_v34  ;;  %998 = vmatprep.mubr.f32.mxu0 %v4540_v35  ;;  %v4567_v34 = vld [vmem:[#allocation34_spill] sm:$0xff] }
 0x2e4   :  { %2764 = vmatpush3.msra.mxu1 %v4563_v39  ;;  %2765 = vmatprep.mubr.msk.f32.mxu1 %vm3415_vm1, %v4540_v35  ;;  %v283_v33 = vadd.f32 %v4567_v34, %v3806_v32 }
 0x2e5   :  { %1096 = vmatprep.subr.mxu0 %v4564_v61  ;;  %2768 = vmatprep.subr.mxu1 %v4540_v35 }
 0x384   :  { %v838_v58 = vpop.f32.mrf.mxu0  ;;  %v909_v4 = vpop.f32.mrf.mxu1 }
 0x385   :  { %v839_v62 = vadd.f32 %v838_v58, %v4566_v45  ;;  %v910_v58 = vadd.f32 %v909_v4, %v3812_v44  ;;  %v4083_v4 = vld [vmem:[#allocation7 + $0x150] sm:$0xff] }
 0x386   :  { %v840_v5 = vpop.f32.mrf.mxu0  ;;  %v2732_v2 = vpop.f32.mrf.mxu1 }
 0x387   :  { %v913_v59 = vadd.f32 %v839_v62, %v281_v57  ;;  %v841_v39 = vadd.f32 %v840_v5, %v3804_v0  ;;  %v4568_v57 = vld [vmem:[#allocation37_spill] sm:$0xff] }
 0x389   :  { %v2354_v1 = vmul.f32 -1.442695, %v913_v59  ;;  %v920_v61 = vadd.f32 %v841_v39, %v283_v33  ;;  %v4079_v39 = vld [vmem:[#allocation7 + $0x158] sm:$0xff] }
 0x38b   :  { %3124 = vpow2.f32 %v2354_v1  ;;  %v2355_v60 = vmul.f32 -1.442695, %v920_v61  ;;  %v4089_v61 = vld [vmem:[#allocation7 + $0x140] sm:$0xff] }
 0x38d   :  { %3126 = vpow2.f32 %v2355_v60 }
 0x398   :  { %v3125_v63 = vpop.eup %3124 }
 0x399   :  { %v917_v36 = vadd.f32 1.0, %v3125_v63  ;;  %v4076_v63 = vld [vmem:[#allocation7 + $0x178] sm:$0xff] }
 0x39a   :  { %v3127_v42 = vpop.eup %3126 }
 0x39b   :  { %3128 = vrcp.f32 %v917_v36  ;;  %v924_v31 = vadd.f32 1.0, %v3127_v42  ;;  %v4069_v42 = vld [vmem:[#allocation7 + $0x170] sm:$0xff]  ;;  %v4073_v36 = vld [vmem:[#allocation7 + $0x168] sm:$0xff] }
 0x39d   :  { %3130 = vrcp.f32 %v924_v31  ;;  %v4093_v31 = vld [vmem:[#allocation7 + $0x138] sm:$0xff] }
 0x3a8   :  { %v3129_v45 = vpop.eup %3128 }
 0x3a9   :  { %v927_v2 = vmul.f32 %v3129_v45, %v910_v58  ;;  %v4086_v45 = vld [vmem:[#allocation7 + $0x160] sm:$0xff]  ;;  %v4096_v58 = vld [vmem:[#allocation7 + $0x148] sm:$0xff] }
 0x3aa   :  { %v3131_v5 = vpop.eup %3130 }
 0x3ab   :  { %v928_v62 = vadd.f32 %v927_v2, %v4568_v57  ;;  %v930_v59 = vsub.f32 1.0, %v3131_v5  ;;  %v932_v33 = vmul.f32 %v3131_v5, %v3897_v3  ;;  %v4099_v2 = vld [vmem:[#allocation7 + $0x128] sm:$0xff]  ;;  %v4103_v57 = vld [vmem:[#allocation7 + $0x120] sm:$0xff]  ;;  %v4109_v5 = vld [vmem:[#allocation7 + $0x110] sm:$0xff] }
 0x3ad   :  { %3132 = vtanh.f32 %v928_v62  ;;  %v4106_v62 = vld [vmem:[#allocation7 + $0x130] sm:$0xff] }
 0x3ba   :  { %v3133_v34 = vpop.eup %3132 }
 0x3bb   :  { %v931_v1 = vmul.f32 %v3133_v34, %v930_v59  ;;  %v4113_v59 = vld [vmem:[#allocation7 + $0x108] sm:$0xff]  ;;  %v4116_v34 = vld [vmem:[#allocation7 + $0x118] sm:$0xff] }
 0x3bd   :  { %v3977_v60 = vadd.f32 %v932_v33, %v931_v1  ;;  %v4119_v1 = vld [vmem:[#allocation7 + $0xf8] sm:$0xff]  ;;  %v4123_v33 = vld [vmem:[#allocation7 + $0xf0] sm:$0xff] }
 0x3bf   :  { %4569 = vst [vmem:[#allocation20_spill] sm:$0xff] %v3977_v60  ;;  %999 = vmatmul.mubr.f32.vlgmr.msra.gmra.mxu0 %v3977_v60  ;;  %2766 = vmatmul.mubr.f32.vlgmr.msra.gmra.mxu1 %v3977_v60 }
 0x3c0   :  { %1097 = vmatpush1.msra.mxu0 %v3477_v6  ;;  %2769 = vmatpush3.msra.mxu1 %v3575_v37  ;;  %v4570_v6 = vld [vmem:[#allocation27_spill] sm:$0xff] }
 0x3c1   :  { %1098 = vmatprep.subr.mxu0 %v3481_v7  ;;  %2770 = vmatprep.subr.mxu1 %v4540_v35  ;;  %v4571_v7 = vld [vmem:[#allocation22_spill] sm:$0xff] }
 0x3c2   :  { %1099 = vmatpush1.msra.mxu0 %v3483_v8  ;;  %2771 = vmatpush3.msra.mxu1 %v3579_v40  ;;  %v4572_v8 = vld [vmem:[#allocation23_spill] sm:$0xff] }
 0x3c3   :  { %1100 = vmatprep.subr.mxu0 %v3488_v9  ;;  %2772 = vmatprep.subr.mxu1 %v4540_v35  ;;  %v4573_v9 = vld [vmem:[#allocation28_spill] sm:$0xff] }
 0x3c4   :  { %1101 = vmatpush1.msra.mxu0 %v3491_v10  ;;  %2773 = vmatpush3.msra.mxu1 %v3587_v43  ;;  %v4574_v10 = vld [vmem:[#allocation24_spill] sm:$0xff] }
 0x3c5   :  { %1102 = vmatprep.subr.mxu0 %v3494_v11  ;;  %2774 = vmatprep.subr.mxu1 %v4540_v35  ;;  %v4575_v11 = vld [vmem:[#allocation25_spill] sm:$0xff] }
 0x3c6   :  { %1103 = vmatpush1.msra.mxu0 %v3497_v12  ;;  %2775 = vmatpush3.msra.mxu1 %v3594_v46  ;;  %v4576_v12 = vld [vmem:[#allocation29_spill] sm:$0xff] }
 0x3c7   :  { %1104 = vmatprep.subr.mxu0 %v3500_v13  ;;  %2776 = vmatprep.subr.mxu1 %v4540_v35  ;;  %v4046_v13 = vld [vmem:[#allocation7 + $0x188] sm:$0xff] }
 0x3c8   :  { %1105 = vmatpush1.msra.mxu0 %v3503_v14  ;;  %2777 = vmatpush3.msra.mxu1 %v3600_v47  ;;  %4577 = vst [vmem:[#allocation21_spill] sm:$0xff] %v4046_v13 }
 0x3c9   :  { %1106 = vmatprep.subr.mxu0 %v3506_v15  ;;  %2778 = vmatprep.subr.mxu1 %v4540_v35 }
 0x3ca   :  { %1107 = vmatpush1.msra.mxu0 %v3509_v16  ;;  %2779 = vmatpush3.msra.mxu1 %v3607_v49  ;;  %v4578_v16 = vld [vmem:[#allocation36_spill] sm:$0xff]  ;;  %v4581_v49 = vld [vmem:[#allocation35_spill] sm:$0xff] }
 0x3cb   :  { %1108 = vmatprep.subr.mxu0 %v3512_v17  ;;  %2780 = vmatprep.subr.mxu1 %v4540_v35  ;;  %v287_v17 = vadd.f32 %v4578_v16, %v4552_v41  ;;  %v4156_v16 = vld [vmem:[#allocation7 + $0xb8] sm:$0xff] }
 0x3cc   :  { %1109 = vmatpush1.msra.mxu0 %v3515_v18  ;;  %2781 = vmatpush3.msra.mxu1 %v3612_v50  ;;  %v4579_v18 = vld [vmem:[#allocation51_spill] sm:$0xff] }
 0x3cd   :  { %1110 = vmatprep.subr.mxu0 %v3518_v19  ;;  %2782 = vmatprep.subr.mxu1 %v4540_v35 }
 0x3ce   :  { %1111 = vmatpush1.msra.mxu0 %v3521_v20  ;;  %2783 = vmatpush3.msra.mxu1 %v3619_v51 }
 0x3cf   :  { %1112 = vmatprep.subr.mxu0 %v3524_v21  ;;  %2784 = vmatprep.subr.mxu1 %v4540_v35 }
 0x3d0   :  { %1113 = vmatpush1.msra.mxu0 %v3527_v22  ;;  %2785 = vmatpush3.msra.mxu1 %v3624_v52 }
 0x3d1   :  { %1114 = vmatprep.subr.mxu0 %v3530_v23  ;;  %2786 = vmatprep.subr.mxu1 %v4540_v35 }
 0x3d2   :  { %1115 = vmatpush1.msra.mxu0 %v3533_v24  ;;  %2787 = vmatpush3.msra.mxu1 %v3629_v53 }
 0x3d3   :  { %1116 = vmatprep.subr.mxu0 %v3536_v25  ;;  %2788 = vmatprep.subr.mxu1 %v4540_v35  ;;  %v4580_v25 = vld [vmem:[#allocation38_spill] sm:$0xff] }
 0x3d4   :  { %1117 = vmatpush1.msra.mxu0 %v3539_v26  ;;  %2789 = vmatpush3.msra.mxu1 %v3634_v54  ;;  %v289_v26 = vadd.f32 %v4580_v25, %v3806_v32  ;;  %v4183_v25 = vld [vmem:[#allocation7 + $0x60] sm:$0xff] }
 0x3d5   :  { %1118 = vmatprep.subr.mxu0 %v3542_v27  ;;  %2790 = vmatprep.subr.mxu1 %v4540_v35 }
 0x3d6   :  { %1119 = vmatpush1.msra.mxu0 %v3545_v28  ;;  %2791 = vmatpush3.msra.mxu1 %v3639_v55 }
 0x3d7   :  { %1120 = vmatprep.subr.mxu0 %v3548_v29  ;;  %2792 = vmatprep.subr.mxu1 %v4540_v35 }
 0x3d8   :  { %1121 = vmatpush1.msra.mxu0 %v3551_v30  ;;  %2793 = vmatpush3.msra.mxu1 %v4541_v56 }
 0x3d9   :  { %1122 = vmatprep.subr.mxu0 %v4542_v38  ;;  %2794 = vmatprep.subr.mxu1 %v4540_v35  ;;  %v4063_v38 = vld [vmem:[#allocation7 + $0x180] sm:$0xff] }
 0x3da   :  { %1123 = vmatpush1.msra.mxu0 %v4543_v48  ;;  %2795 = vmatpush3.msra.mxu1 %v4570_v6  ;;  %v4066_v48 = vld [vmem:[#allocation7 + $0x190] sm:$0xff]  ;;  %v4126_v6 = vld [vmem:[#allocation7 + $0x100] sm:$0xff] }
 0x3db   :  { %1124 = vmatprep.subr.mxu0 %v4571_v7  ;;  %2796 = vmatprep.subr.mxu1 %v4540_v35  ;;  %v4129_v7 = vld [vmem:[#allocation7 + $0xe0] sm:$0xff] }
 0x3dc   :  { %1125 = vmatpush1.msra.mxu0 %v4572_v8  ;;  %2797 = vmatpush3.msra.mxu1 %v4573_v9  ;;  %v4133_v8 = vld [vmem:[#allocation7 + $0xd8] sm:$0xff]  ;;  %v4136_v9 = vld [vmem:[#allocation7 + $0xe8] sm:$0xff] }
 0x3dd   :  { %1126 = vmatprep.subr.mxu0 %v4574_v10  ;;  %2798 = vmatprep.subr.mxu1 %v4540_v35  ;;  %v4139_v10 = vld [vmem:[#allocation7 + $0xc8] sm:$0xff] }
 0x3de   :  { %1127 = vmatpush1.msra.mxu0 %v4575_v11  ;;  %1160 = vmatprep.mubr.f32.mxu0 %v4540_v35  ;;  %v4143_v11 = vld [vmem:[#allocation7 + $0xc0] sm:$0xff] }
 0x3df   :  { %2799 = vmatpush3.msra.mxu1 %v4576_v12  ;;  %2800 = vmatprep.mubr.msk.f32.mxu1 %vm3415_vm1, %v4540_v35  ;;  %v4146_v12 = vld [vmem:[#allocation7 + $0xd0] sm:$0xff] }
 0x3e0   :  { %1258 = vmatprep.subr.mxu0 %v4046_v13  ;;  %2803 = vmatprep.subr.mxu1 %v4540_v35 }
 0x47f   :  { %v1000_v14 = vpop.f32.mrf.mxu0  ;;  %v1071_v15 = vpop.f32.mrf.mxu1 }
 0x480   :  { %v1001_v19 = vadd.f32 %v1000_v14, %v4579_v18  ;;  %v1072_v43 = vadd.f32 %v1071_v15, %v3812_v44  ;;  %v4149_v14 = vld [vmem:[#allocation7 + $0xb0] sm:$0xff]  ;;  %v4153_v15 = vld [vmem:[#allocation7 + $0xa8] sm:$0xff] }
 0x481   :  { %v1002_v20 = vpop.f32.mrf.mxu0  ;;  %v2767_v21 = vpop.f32.mrf.mxu1 }
 0x482   :  { %v1075_v22 = vadd.f32 %v1001_v19, %v287_v17  ;;  %v1003_v24 = vadd.f32 %v1002_v20, %v3804_v0  ;;  %v4159_v17 = vld [vmem:[#allocation7 + $0x98] sm:$0xff]  ;;  %v4163_v19 = vld [vmem:[#allocation7 + $0x90] sm:$0xff]  ;;  %v4166_v20 = vld [vmem:[#allocation7 + $0xa0] sm:$0xff] }
 0x483   :  { %v4169_v21 = vld [vmem:[#allocation7 + $0x80] sm:$0xff] }
 0x484   :  { %v2356_v23 = vmul.f32 -1.442695, %v1075_v22  ;;  %v1082_v27 = vadd.f32 %v1003_v24, %v289_v26  ;;  %v4173_v22 = vld [vmem:[#allocation7 + $0x78] sm:$0xff]  ;;  %v4179_v24 = vld [vmem:[#allocation7 + $0x68] sm:$0xff]  ;;  %v4186_v26 = vld [vmem:[#allocation7 + $0x70] sm:$0xff] }
 0x486   :  { %3134 = vpow2.f32 %v2356_v23  ;;  %v2357_v28 = vmul.f32 -1.442695, %v1082_v27  ;;  %v4176_v23 = vld [vmem:[#allocation7 + $0x88] sm:$0xff]  ;;  %v4189_v27 = vld [vmem:[#allocation7 + $0x50] sm:$0xff] }
 0x488   :  { %3136 = vpow2.f32 %v2357_v28  ;;  %v4193_v28 = vld [vmem:[#allocation7 + $0x48] sm:$0xff] }
 0x493   :  { %v3135_v29 = vpop.eup %3134 }
 0x494   :  { %v1079_v30 = vadd.f32 1.0, %v3135_v29  ;;  %v4196_v29 = vld [vmem:[#allocation7 + $0x58] sm:$0xff] }
 0x495   :  { %v3137_v37 = vpop.eup %3136  ;;  %4583 = vst [vmem:[#allocation30_spill] sm:$0xff] %v4196_v29 }
 0x496   :  { %3138 = vrcp.f32 %v1079_v30  ;;  %v1086_v40 = vadd.f32 1.0, %v3137_v37  ;;  %v4199_v30 = vld [vmem:[#allocation7 + $0x38] sm:$0xff]  ;;  %v4203_v37 = vld [vmem:[#allocation7 + $0x30] sm:$0xff] }
 0x497   :  { %4584 = vst [vmem:[#allocation32_spill] sm:$0xff] %v4199_v30  ;;  %4585 = vst [vmem:[#allocation31_spill] sm:$0xff] %v4203_v37 }
 0x498   :  { %3140 = vrcp.f32 %v1086_v40  ;;  %v4206_v40 = vld [vmem:[#allocation7 + $0x40] sm:$0xff] }
 0x499   :  { %4586 = vst [vmem:[#allocation19_spill] sm:$0xff] %v4206_v40 }
 0x4a3   :  { %v3139_v46 = vpop.eup %3138 }
 0x4a4   :  { %v1089_v47 = vmul.f32 %v3139_v46, %v1072_v43  ;;  %v4209_v43 = vld [vmem:[#allocation7 + $0x20] sm:$0xff]  ;;  %v4213_v46 = vld [vmem:[#allocation7 + $0x18] sm:$0xff] }
 0x4a5   :  { %v3141_v51 = vpop.eup %3140  ;;  %4587 = vst [vmem:[#allocation33_spill] sm:$0xff] %v4209_v43  ;;  %4588 = vst [vmem:[#allocation34_spill] sm:$0xff] %v4213_v46 }
 0x4a6   :  { %v1090_v50 = vadd.f32 %v1089_v47, %v4581_v49  ;;  %v1092_v52 = vsub.f32 1.0, %v3141_v51  ;;  %v1094_v55 = vmul.f32 %v3141_v51, %v3977_v60  ;;  %v4217_v47 = vld [vmem:[#allocation7 + $0x28] sm:$0xff] }
 0x4a7   :  { %4589 = vst [vmem:[#allocation37_spill] sm:$0xff] %v4217_v47  ;;  %v4590_v51 = vld [vmem:[#allocation40_spill] sm:$0xff] }
 0x4a8   :  { %3142 = vtanh.f32 %v1090_v50 }
 0x4b5   :  { %v3143_v53 = vpop.eup %3142 }
 0x4b6   :  { %v1093_v54 = vmul.f32 %v3143_v53, %v1092_v52  ;;  %v293_v52 = vadd.f32 %v4590_v51, %v4552_v41 }
 0x4b8   :  { %v4059_v56 = vadd.f32 %v1094_v55, %v1093_v54 }
 0x4ba   :  { %4582 = vst [vmem:[#allocation50_spill] sm:$0xff] %v4059_v56  ;;  %1161 = vmatmul.mubr.f32.vlgmr.msra.gmra.mxu0 %v4059_v56  ;;  %2801 = vmatmul.mubr.f32.vlgmr.msra.gmra.mxu1 %v4059_v56 }
 0x4bb   :  { %1259 = vmatpush1.msra.mxu0 %v4063_v38  ;;  %2804 = vmatpush3.msra.mxu1 %v4066_v48 }
 0x4bc   :  { %1260 = vmatprep.subr.mxu0 %v4069_v42  ;;  %2805 = vmatprep.subr.mxu1 %v4540_v35 }
 0x4bd   :  { %1261 = vmatpush1.msra.mxu0 %v4073_v36  ;;  %2806 = vmatpush3.msra.mxu1 %v4076_v63 }
 0x4be   :  { %1262 = vmatprep.subr.mxu0 %v4079_v39  ;;  %2807 = vmatprep.subr.mxu1 %v4540_v35 }
 0x4bf   :  { %1263 = vmatpush1.msra.mxu0 %v4083_v4  ;;  %2808 = vmatpush3.msra.mxu1 %v4086_v45 }
 0x4c0   :  { %1264 = vmatprep.subr.mxu0 %v4089_v61  ;;  %2809 = vmatprep.subr.mxu1 %v4540_v35 }
 0x4c1   :  { %1265 = vmatpush1.msra.mxu0 %v4093_v31  ;;  %2810 = vmatpush3.msra.mxu1 %v4096_v58 }
 0x4c2   :  { %1266 = vmatprep.subr.mxu0 %v4099_v2  ;;  %2811 = vmatprep.subr.mxu1 %v4540_v35 }
 0x4c3   :  { %1267 = vmatpush1.msra.mxu0 %v4103_v57  ;;  %2812 = vmatpush3.msra.mxu1 %v4106_v62 }
 0x4c4   :  { %1268 = vmatprep.subr.mxu0 %v4109_v5  ;;  %2813 = vmatprep.subr.mxu1 %v4540_v35 }
 0x4c5   :  { %1269 = vmatpush1.msra.mxu0 %v4113_v59  ;;  %2814 = vmatpush3.msra.mxu1 %v4116_v34 }
 0x4c6   :  { %1270 = vmatprep.subr.mxu0 %v4119_v1  ;;  %2815 = vmatprep.subr.mxu1 %v4540_v35 }
 0x4c7   :  { %1271 = vmatpush1.msra.mxu0 %v4123_v33  ;;  %2816 = vmatpush3.msra.mxu1 %v4126_v6 }
 0x4c8   :  { %1272 = vmatprep.subr.mxu0 %v4129_v7  ;;  %2817 = vmatprep.subr.mxu1 %v4540_v35 }
 0x4c9   :  { %1273 = vmatpush1.msra.mxu0 %v4133_v8  ;;  %2818 = vmatpush3.msra.mxu1 %v4136_v9 }
 0x4ca   :  { %1274 = vmatprep.subr.mxu0 %v4139_v10  ;;  %2819 = vmatprep.subr.mxu1 %v4540_v35 }
 0x4cb   :  { %1275 = vmatpush1.msra.mxu0 %v4143_v11  ;;  %2820 = vmatpush3.msra.mxu1 %v4146_v12 }
 0x4cc   :  { %1276 = vmatprep.subr.mxu0 %v4149_v14  ;;  %2821 = vmatprep.subr.mxu1 %v4540_v35 }
 0x4cd   :  { %1277 = vmatpush1.msra.mxu0 %v4153_v15  ;;  %2822 = vmatpush3.msra.mxu1 %v4156_v16 }
 0x4ce   :  { %1278 = vmatprep.subr.mxu0 %v4159_v17  ;;  %2823 = vmatprep.subr.mxu1 %v4540_v35 }
 0x4cf   :  { %1279 = vmatpush1.msra.mxu0 %v4163_v19  ;;  %2824 = vmatpush3.msra.mxu1 %v4166_v20 }
 0x4d0   :  { %1280 = vmatprep.subr.mxu0 %v4169_v21  ;;  %2825 = vmatprep.subr.mxu1 %v4540_v35 }
 0x4d1   :  { %1281 = vmatpush1.msra.mxu0 %v4173_v22  ;;  %2826 = vmatpush3.msra.mxu1 %v4176_v23 }
 0x4d2   :  { %1282 = vmatprep.subr.mxu0 %v4179_v24  ;;  %2827 = vmatprep.subr.mxu1 %v4540_v35 }
 0x4d3   :  { %1283 = vmatpush1.msra.mxu0 %v4183_v25  ;;  %2828 = vmatpush3.msra.mxu1 %v4186_v26 }
 0x4d4   :  { %1284 = vmatprep.subr.mxu0 %v4189_v27  ;;  %2829 = vmatprep.subr.mxu1 %v4540_v35 }
 0x4d5   :  { %1285 = vmatpush1.msra.mxu0 %v4193_v28  ;;  %2830 = vmatpush3.msra.mxu1 %v4196_v29 }
 0x4d6   :  { %1286 = vmatprep.subr.mxu0 %v4199_v30  ;;  %2831 = vmatprep.subr.mxu1 %v4540_v35 }
 0x4d7   :  { %1287 = vmatpush1.msra.mxu0 %v4203_v37  ;;  %2832 = vmatpush3.msra.mxu1 %v4206_v40 }
 0x4d8   :  { %1288 = vmatprep.subr.mxu0 %v4209_v43  ;;  %2833 = vmatprep.subr.mxu1 %v4540_v35 }
 0x4d9   :  { %1289 = vmatpush1.msra.mxu0 %v4213_v46  ;;  %1322 = vmatprep.mubr.f32.mxu0 %v4540_v35  ;;  %v4591_v46 = vld [vmem:[#allocation42_spill] sm:$0xff] }
 0x4da   :  { %2834 = vmatpush3.msra.mxu1 %v4217_v47  ;;  %2835 = vmatprep.mubr.msk.f32.mxu1 %vm3415_vm1, %v4540_v35  ;;  %v295_v43 = vadd.f32 %v4591_v46, %v3806_v32 }
 0x4db   :  { %1420 = vmatprep.subr.mxu0 %v4046_v13  ;;  %2838 = vmatprep.subr.mxu1 %v4540_v35 }
 0x57a   :  { %v1162_v49 = vpop.f32.mrf.mxu0  ;;  %v1233_v50 = vpop.f32.mrf.mxu1 }
 0x57b   :  { %v1163_v53 = vadd.f32 %v1162_v49, %v4579_v18  ;;  %v1234_v49 = vadd.f32 %v1233_v50, %v3812_v44  ;;  %v4599_v50 = vld [vmem:[#allocation37_spill] sm:$0xff] }
 0x57c   :  { %v1164_v54 = vpop.f32.mrf.mxu0  ;;  %v2802_v55 = vpop.f32.mrf.mxu1 }
 0x57d   :  { %v1237_v60 = vadd.f32 %v1163_v53, %v293_v52  ;;  %v1165_v47 = vadd.f32 %v1164_v54, %v3804_v0 }
 0x57f   :  { %v2358_v3 = vmul.f32 -1.442695, %v1237_v60  ;;  %v1244_v13 = vadd.f32 %v1165_v47, %v295_v43  ;;  %v4592_v60 = vld [vmem:[#allocation41_spill] sm:$0xff]  ;;  %v4598_v47 = vld [vmem:[#allocation34_spill] sm:$0xff] }
 0x580   :  { %v4597_v43 = vld [vmem:[#allocation33_spill] sm:$0xff] }
 0x581   :  { %3144 = vpow2.f32 %v2358_v3  ;;  %v2359_v40 = vmul.f32 -1.442695, %v1244_v13 }
 0x583   :  { %3146 = vpow2.f32 %v2359_v40 }
 0x58e   :  { %v3145_v37 = vpop.eup %3144 }
 0x58f   :  { %v1241_v30 = vadd.f32 1.0, %v3145_v37  ;;  %v4596_v37 = vld [vmem:[#allocation19_spill] sm:$0xff] }
 0x590   :  { %v3147_v29 = vpop.eup %3146 }
 0x591   :  { %3148 = vrcp.f32 %v1241_v30  ;;  %v1248_v51 = vadd.f32 1.0, %v3147_v29  ;;  %v4594_v29 = vld [vmem:[#allocation32_spill] sm:$0xff]  ;;  %v4595_v30 = vld [vmem:[#allocation31_spill] sm:$0xff] }
 0x593   :  { %3150 = vrcp.f32 %v1248_v51  ;;  %v4600_v51 = vld [vmem:[#allocation21_spill] sm:$0xff] }
 0x59e   :  { %v3149_v18 = vpop.eup %3148 }
 0x59f   :  { %v1251_v55 = vmul.f32 %v3149_v18, %v1234_v49  ;;  %v4593_v18 = vld [vmem:[#allocation30_spill] sm:$0xff] }
 0x5a0   :  { %v3151_v53 = vpop.eup %3150 }
 0x5a1   :  { %v1252_v52 = vadd.f32 %v1251_v55, %v4592_v60  ;;  %v1254_v54 = vsub.f32 1.0, %v3151_v53  ;;  %v1256_v13 = vmul.f32 %v3151_v53, %v4059_v56  ;;  %v4601_v60 = vld [vmem:[#allocation44_spill] sm:$0xff]  ;;  %v4602_v53 = vld [vmem:[#allocation51_spill] sm:$0xff] }
 0x5a3   :  { %3152 = vtanh.f32 %v1252_v52  ;;  %v299_v52 = vadd.f32 %v4601_v60, %v4552_v41 }
 0x5b0   :  { %v3153_v46 = vpop.eup %3152 }
 0x5b1   :  { %v1255_v3 = vmul.f32 %v3153_v46, %v1254_v54 }
 0x5b3   :  { %v4233_v40 = vadd.f32 %v1256_v13, %v1255_v3 }
 0x5b5   :  { %1323 = vmatmul.mubr.f32.vlgmr.msra.gmra.mxu0 %v4233_v40  ;;  %2836 = vmatmul.mubr.f32.vlgmr.msra.gmra.mxu1 %v4233_v40 }
 0x5b6   :  { %1421 = vmatpush1.msra.mxu0 %v4063_v38  ;;  %2839 = vmatpush3.msra.mxu1 %v4066_v48 }
 0x5b7   :  { %1422 = vmatprep.subr.mxu0 %v4069_v42  ;;  %2840 = vmatprep.subr.mxu1 %v4540_v35 }
 0x5b8   :  { %1423 = vmatpush1.msra.mxu0 %v4073_v36  ;;  %2841 = vmatpush3.msra.mxu1 %v4076_v63 }
 0x5b9   :  { %1424 = vmatprep.subr.mxu0 %v4079_v39  ;;  %2842 = vmatprep.subr.mxu1 %v4540_v35 }
 0x5ba   :  { %1425 = vmatpush1.msra.mxu0 %v4083_v4  ;;  %2843 = vmatpush3.msra.mxu1 %v4086_v45 }
 0x5bb   :  { %1426 = vmatprep.subr.mxu0 %v4089_v61  ;;  %2844 = vmatprep.subr.mxu1 %v4540_v35 }
 0x5bc   :  { %1427 = vmatpush1.msra.mxu0 %v4093_v31  ;;  %2845 = vmatpush3.msra.mxu1 %v4096_v58 }
 0x5bd   :  { %1428 = vmatprep.subr.mxu0 %v4099_v2  ;;  %2846 = vmatprep.subr.mxu1 %v4540_v35 }
 0x5be   :  { %1429 = vmatpush1.msra.mxu0 %v4103_v57  ;;  %2847 = vmatpush3.msra.mxu1 %v4106_v62 }
 0x5bf   :  { %1430 = vmatprep.subr.mxu0 %v4109_v5  ;;  %2848 = vmatprep.subr.mxu1 %v4540_v35 }
 0x5c0   :  { %1431 = vmatpush1.msra.mxu0 %v4113_v59  ;;  %2849 = vmatpush3.msra.mxu1 %v4116_v34 }
 0x5c1   :  { %1432 = vmatprep.subr.mxu0 %v4119_v1  ;;  %2850 = vmatprep.subr.mxu1 %v4540_v35 }
 0x5c2   :  { %1433 = vmatpush1.msra.mxu0 %v4123_v33  ;;  %2851 = vmatpush3.msra.mxu1 %v4126_v6 }
 0x5c3   :  { %1434 = vmatprep.subr.mxu0 %v4129_v7  ;;  %2852 = vmatprep.subr.mxu1 %v4540_v35 }
 0x5c4   :  { %1435 = vmatpush1.msra.mxu0 %v4133_v8  ;;  %2853 = vmatpush3.msra.mxu1 %v4136_v9 }
 0x5c5   :  { %1436 = vmatprep.subr.mxu0 %v4139_v10  ;;  %2854 = vmatprep.subr.mxu1 %v4540_v35 }
 0x5c6   :  { %1437 = vmatpush1.msra.mxu0 %v4143_v11  ;;  %2855 = vmatpush3.msra.mxu1 %v4146_v12 }
 0x5c7   :  { %1438 = vmatprep.subr.mxu0 %v4149_v14  ;;  %2856 = vmatprep.subr.mxu1 %v4540_v35 }
 0x5c8   :  { %1439 = vmatpush1.msra.mxu0 %v4153_v15  ;;  %2857 = vmatpush3.msra.mxu1 %v4156_v16 }
 0x5c9   :  { %1440 = vmatprep.subr.mxu0 %v4159_v17  ;;  %2858 = vmatprep.subr.mxu1 %v4540_v35 }
 0x5ca   :  { %1441 = vmatpush1.msra.mxu0 %v4163_v19  ;;  %2859 = vmatpush3.msra.mxu1 %v4166_v20 }
 0x5cb   :  { %1442 = vmatprep.subr.mxu0 %v4169_v21  ;;  %2860 = vmatprep.subr.mxu1 %v4540_v35 }
 0x5cc   :  { %1443 = vmatpush1.msra.mxu0 %v4173_v22  ;;  %2861 = vmatpush3.msra.mxu1 %v4176_v23 }
 0x5cd   :  { %1444 = vmatprep.subr.mxu0 %v4179_v24  ;;  %2862 = vmatprep.subr.mxu1 %v4540_v35 }
 0x5ce   :  { %1445 = vmatpush1.msra.mxu0 %v4183_v25  ;;  %2863 = vmatpush3.msra.mxu1 %v4186_v26 }
 0x5cf   :  { %1446 = vmatprep.subr.mxu0 %v4189_v27  ;;  %2864 = vmatprep.subr.mxu1 %v4540_v35 }
 0x5d0   :  { %1447 = vmatpush1.msra.mxu0 %v4193_v28  ;;  %2865 = vmatpush3.msra.mxu1 %v4593_v18 }
 0x5d1   :  { %1448 = vmatprep.subr.mxu0 %v4594_v29  ;;  %2866 = vmatprep.subr.mxu1 %v4540_v35 }
 0x5d2   :  { %1449 = vmatpush1.msra.mxu0 %v4595_v30  ;;  %2867 = vmatpush3.msra.mxu1 %v4596_v37 }
 0x5d3   :  { %1450 = vmatprep.subr.mxu0 %v4597_v43  ;;  %2868 = vmatprep.subr.mxu1 %v4540_v35 }
 0x5d4   :  { %1451 = vmatpush1.msra.mxu0 %v4598_v47  ;;  %1484 = vmatprep.mubr.f32.mxu0 %v4540_v35  ;;  %v4603_v47 = vld [vmem:[#allocation46_spill] sm:$0xff] }
 0x5d5   :  { %2869 = vmatpush3.msra.mxu1 %v4599_v50  ;;  %2870 = vmatprep.mubr.msk.f32.mxu1 %vm3415_vm1, %v4540_v35  ;;  %v301_v43 = vadd.f32 %v4603_v47, %v3806_v32 }
 0x5d6   :  { %1582 = vmatprep.subr.mxu0 %v4600_v51  ;;  %2873 = vmatprep.subr.mxu1 %v4540_v35 }
 0x675   :  { %v1324_v49 = vpop.f32.mrf.mxu0  ;;  %v1395_v55 = vpop.f32.mrf.mxu1 }
 0x676   :  { %v1325_v54 = vadd.f32 %v1324_v49, %v4602_v53  ;;  %v1396_v49 = vadd.f32 %v1395_v55, %v3812_v44  ;;  %v1753_v55 = vld [vmem:[#allocation10 + $0x40] sm:$0xff] }
 0x677   :  { %v1326_v46 = vpop.f32.mrf.mxu0  ;;  %v2837_v3 = vpop.f32.mrf.mxu1 }
 0x678   :  { %v1399_v13 = vadd.f32 %v1325_v54, %v299_v52  ;;  %v1327_v50 = vadd.f32 %v1326_v46, %v3804_v0  ;;  %v4604_v52 = vld [vmem:[#allocation39_spill] sm:$0xff] }
 0x67a   :  { %v2360_v56 = vmul.f32 -1.442695, %v1399_v13  ;;  %v1406_v51 = vadd.f32 %v1327_v50, %v301_v43  ;;  %v1754_v50 = vld [vmem:[#allocation10 + $0x48] sm:$0xff] }
 0x67c   :  { %3154 = vpow2.f32 %v2360_v56  ;;  %v2361_v37 = vmul.f32 -1.442695, %v1406_v51  ;;  %v1751_v51 = vld [vmem:[#allocation10 + $0x30] sm:$0xff] }
 0x67e   :  { %3156 = vpow2.f32 %v2361_v37 }
 0x689   :  { %v3155_v30 = vpop.eup %3154 }
 0x68a   :  { %v1403_v29 = vadd.f32 1.0, %v3155_v30  ;;  %v1755_v30 = vld [vmem:[#allocation10 + $0x50] sm:$0xff] }
 0x68b   :  { %v3157_v18 = vpop.eup %3156 }
 0x68c   :  { %3158 = vrcp.f32 %v1403_v29  ;;  %v1410_v60 = vadd.f32 1.0, %v3157_v18  ;;  %v1757_v18 = vld [vmem:[#allocation10 + $0x60] sm:$0xff]  ;;  %v1756_v29 = vld [vmem:[#allocation10 + $0x58] sm:$0xff] }
 0x68e   :  { %3160 = vrcp.f32 %v1410_v60  ;;  %v1750_v60 = vld [vmem:[#allocation10 + $0x28] sm:$0xff] }
 0x699   :  { %v3159_v53 = vpop.eup %3158 }
 0x69a   :  { %v1413_v3 = vmul.f32 %v3159_v53, %v1396_v49  ;;  %v1752_v53 = vld [vmem:[#allocation10 + $0x38] sm:$0xff]  ;;  %v1749_v49 = vld [vmem:[#allocation10 + $0x20] sm:$0xff] }
 0x69b   :  { %v3161_v46 = vpop.eup %3160 }
 0x69c   :  { %v1414_v54 = vadd.f32 %v1413_v3, %v4604_v52  ;;  %v1416_v13 = vsub.f32 1.0, %v3161_v46  ;;  %v1418_v43 = vmul.f32 %v3161_v46, %v4233_v40  ;;  %v1748_v3 = vld [vmem:[#allocation10 + $0x18] sm:$0xff]  ;;  %v1747_v52 = vld [vmem:[#allocation10 + $0x10] sm:$0xff]  ;;  %v1745_v46 = vld [vmem:[#allocation10] sm:$0xff] }
 0x69e   :  { %3162 = vtanh.f32 %v1414_v54  ;;  %v1746_v54 = vld [vmem:[#allocation10 + $0x8] sm:$0xff] }
 0x6ab   :  { %v3163_v47 = vpop.eup %3162 }
 0x6ac   :  { %v1417_v56 = vmul.f32 %v3163_v47, %v1416_v13  ;;  %v4617_v13 = vld [vmem:[#allocation26_spill] sm:$0xff]  ;;  %v4618_v47 = vld [vmem:[#allocation20_spill] sm:$0xff] }
 0x6ae   :  { %v4313_v37 = vadd.f32 %v1418_v43, %v1417_v56  ;;  %v4619_v56 = vld [vmem:[#allocation50_spill] sm:$0xff]  ;;  %v1897_v43 = vld [vmem:[#allocation10 + $0xf8] sm:$0xff] }
 0x6b0   :  { %1485 = vmatmul.mubr.f32.vlgmr.msra.gmra.mxu0 %v4313_v37  ;;  %2871 = vmatmul.mubr.f32.vlgmr.msra.gmra.mxu1 %v4313_v37 }
 0x6b1   :  { %1583 = vmatpush1.msra.mxu0 %v4063_v38  ;;  %2874 = vmatpush3.msra.mxu1 %v4066_v48  ;;  %v4605_v38 = vld [vmem:[#allocation30_spill] sm:$0xff]  ;;  %v4606_v48 = vld [vmem:[#allocation32_spill] sm:$0xff] }
 0x6b2   :  { %1584 = vmatprep.subr.mxu0 %v4069_v42  ;;  %2875 = vmatprep.subr.mxu1 %v4540_v35  ;;  %v4607_v42 = vld [vmem:[#allocation31_spill] sm:$0xff] }
 0x6b3   :  { %1585 = vmatpush1.msra.mxu0 %v4073_v36  ;;  %2876 = vmatpush3.msra.mxu1 %v4076_v63  ;;  %v4608_v36 = vld [vmem:[#allocation19_spill] sm:$0xff]  ;;  %v4609_v63 = vld [vmem:[#allocation33_spill] sm:$0xff] }
 0x6b4   :  { %1586 = vmatprep.subr.mxu0 %v4079_v39  ;;  %2877 = vmatprep.subr.mxu1 %v4540_v35  ;;  %v4610_v39 = vld [vmem:[#allocation34_spill] sm:$0xff] }
 0x6b5   :  { %1587 = vmatpush1.msra.mxu0 %v4083_v4  ;;  %2878 = vmatpush3.msra.mxu1 %v4086_v45  ;;  %v4611_v4 = vld [vmem:[#allocation37_spill] sm:$0xff] }
 0x6b6   :  { %1588 = vmatprep.subr.mxu0 %v4089_v61  ;;  %2879 = vmatprep.subr.mxu1 %v4540_v35  ;;  %v1760_v45 = vld [vmem:[#allocation10 + $0x78] sm:$0xff] }
 0x6b7   :  { %1589 = vmatpush1.msra.mxu0 %v4093_v31  ;;  %2880 = vmatpush3.msra.mxu1 %v4096_v58  ;;  %v4612_v58 = vld [vmem:[#allocation47_spill] sm:$0xff] }
 0x6b8   :  { %1590 = vmatprep.subr.mxu0 %v4099_v2  ;;  %2881 = vmatprep.subr.mxu1 %v4540_v35  ;;  %v305_v2 = vadd.f32 %v4612_v58, %v4552_v41  ;;  %v1884_v58 = vld [vmem:[#allocation10 + $0x90] sm:$0xff] }
 0x6b9   :  { %1591 = vmatpush1.msra.mxu0 %v4103_v57  ;;  %2882 = vmatpush3.msra.mxu1 %v4106_v62  ;;  %v4613_v57 = vld [vmem:[#allocation51_spill] sm:$0xff] }
 0x6ba   :  { %1592 = vmatprep.subr.mxu0 %v4109_v5  ;;  %2883 = vmatprep.subr.mxu1 %v4540_v35 }
 0x6bb   :  { %1593 = vmatpush1.msra.mxu0 %v4113_v59  ;;  %2884 = vmatpush3.msra.mxu1 %v4116_v34 }
 0x6bc   :  { %1594 = vmatprep.subr.mxu0 %v4119_v1  ;;  %2885 = vmatprep.subr.mxu1 %v4540_v35 }
 0x6bd   :  { %1595 = vmatpush1.msra.mxu0 %v4123_v33  ;;  %2886 = vmatpush3.msra.mxu1 %v4126_v6  ;;  %v4614_v6 = vld [vmem:[#allocation48_spill] sm:$0xff] }
 0x6be   :  { %1596 = vmatprep.subr.mxu0 %v4129_v7  ;;  %2887 = vmatprep.subr.mxu1 %v4540_v35  ;;  %v307_v7 = vadd.f32 %v4614_v6, %v3806_v32  ;;  %v2030_v6 = vld [vmem:[#allocation10 + $0x150] sm:$0xff] }
 0x6bf   :  { %1597 = vmatpush1.msra.mxu0 %v4133_v8  ;;  %2888 = vmatpush3.msra.mxu1 %v4136_v9 }
 0x6c0   :  { %1598 = vmatprep.subr.mxu0 %v4139_v10  ;;  %2889 = vmatprep.subr.mxu1 %v4540_v35 }
 0x6c1   :  { %1599 = vmatpush1.msra.mxu0 %v4143_v11  ;;  %2890 = vmatpush3.msra.mxu1 %v4146_v12 }
 0x6c2   :  { %1600 = vmatprep.subr.mxu0 %v4149_v14  ;;  %2891 = vmatprep.subr.mxu1 %v4540_v35 }
 0x6c3   :  { %1601 = vmatpush1.msra.mxu0 %v4153_v15  ;;  %2892 = vmatpush3.msra.mxu1 %v4156_v16 }
 0x6c4   :  { %1602 = vmatprep.subr.mxu0 %v4159_v17  ;;  %2893 = vmatprep.subr.mxu1 %v4540_v35  ;;  %v4615_v17 = vld [vmem:[#allocation45_spill] sm:$0xff] }
 0x6c5   :  { %1603 = vmatpush1.msra.mxu0 %v4163_v19  ;;  %2894 = vmatpush3.msra.mxu1 %v4166_v20 }
 0x6c6   :  { %1604 = vmatprep.subr.mxu0 %v4169_v21  ;;  %2895 = vmatprep.subr.mxu1 %v4540_v35 }
 0x6c7   :  { %1605 = vmatpush1.msra.mxu0 %v4173_v22  ;;  %2896 = vmatpush3.msra.mxu1 %v4176_v23 }
 0x6c8   :  { %1606 = vmatprep.subr.mxu0 %v4179_v24  ;;  %2897 = vmatprep.subr.mxu1 %v4540_v35 }
 0x6c9   :  { %1607 = vmatpush1.msra.mxu0 %v4183_v25  ;;  %2898 = vmatpush3.msra.mxu1 %v4186_v26  ;;  %v1759_v26 = vld [vmem:[#allocation10 + $0x70] sm:$0xff] }
 0x6ca   :  { %1608 = vmatprep.subr.mxu0 %v4189_v27  ;;  %2899 = vmatprep.subr.mxu1 %v4540_v35  ;;  %v4616_v27 = vld [vmem:[#allocation53_spill] sm:$0xff] }
 0x6cb   :  { %1609 = vmatpush1.msra.mxu0 %v4193_v28  ;;  %2900 = vmatpush3.msra.mxu1 %v4605_v38  ;;  %v1758_v28 = vld [vmem:[#allocation10 + $0x68] sm:$0xff]  ;;  %v1896_v38 = vld [vmem:[#allocation10 + $0xf0] sm:$0xff] }
 0x6cc   :  { %1610 = vmatprep.subr.mxu0 %v4606_v48  ;;  %2901 = vmatprep.subr.mxu1 %v4540_v35  ;;  %v1895_v48 = vld [vmem:[#allocation10 + $0xe8] sm:$0xff] }
 0x6cd   :  { %1611 = vmatpush1.msra.mxu0 %v4607_v42  ;;  %2902 = vmatpush3.msra.mxu1 %v4608_v36  ;;  %v1894_v42 = vld [vmem:[#allocation10 + $0xe0] sm:$0xff]  ;;  %v1893_v36 = vld [vmem:[#allocation10 + $0xd8] sm:$0xff] }
 0x6ce   :  { %1612 = vmatprep.subr.mxu0 %v4609_v63  ;;  %2903 = vmatprep.subr.mxu1 %v4540_v35  ;;  %v1890_v63 = vld [vmem:[#allocation10 + $0xc0] sm:$0xff] }
 0x6cf   :  { %1613 = vmatpush1.msra.mxu0 %v4610_v39  ;;  %1646 = vmatprep.mubr.f32.mxu0 %v4540_v35  ;;  %v1889_v39 = vld [vmem:[#allocation10 + $0xb8] sm:$0xff] }
 0x6d0   :  { %2904 = vmatpush3.msra.mxu1 %v4611_v4  ;;  %2905 = vmatprep.mubr.msk.f32.mxu1 %vm3415_vm1, %v4540_v35  ;;  %v1888_v4 = vld [vmem:[#allocation10 + $0xb0] sm:$0xff] }
 0x6d1   :  { %2908 = vmatprep.subr.mxu0 %v1760_v45  ;;  %2952 = vmatprep.subr.mxu1 %v1897_v43 }
 0x770   :  { %v1486_v61 = vpop.f32.mrf.mxu0  ;;  %v1557_v31 = vpop.f32.mrf.mxu1 }
 0x771   :  { %v1487_v62 = vadd.f32 %v1486_v61, %v4613_v57  ;;  %v1558_v14 = vadd.f32 %v1557_v31, %v3812_v44  ;;  %v1886_v61 = vld [vmem:[#allocation10 + $0xa0] sm:$0xff]  ;;  %v1885_v31 = vld [vmem:[#allocation10 + $0x98] sm:$0xff] }
 0x772   :  { %v1488_v5 = vpop.f32.mrf.mxu0  ;;  %v2872_v59 = vpop.f32.mrf.mxu1 }
 0x773   :  { %v1561_v34 = vadd.f32 %v1487_v62, %v305_v2  ;;  %v1489_v33 = vadd.f32 %v1488_v5, %v3804_v0  ;;  %v1883_v2 = vld [vmem:[#allocation10 + $0x88] sm:$0xff]  ;;  %v1882_v62 = vld [vmem:[#allocation10 + $0x80] sm:$0xff]  ;;  %v2035_v5 = vld [vmem:[#allocation10 + $0x178] sm:$0xff] }
 0x774   :  { %v2034_v59 = vld [vmem:[#allocation10 + $0x170] sm:$0xff] }
 0x775   :  { %v2362_v1 = vmul.f32 -1.442695, %v1561_v34  ;;  %v1568_v35 = vadd.f32 %v1489_v33, %v307_v7  ;;  %v2033_v34 = vld [vmem:[#allocation10 + $0x168] sm:$0xff]  ;;  %v2031_v33 = vld [vmem:[#allocation10 + $0x158] sm:$0xff] }
 0x776   :  { %v2029_v7 = vld [vmem:[#allocation10 + $0x148] sm:$0xff] }
 0x777   :  { %3164 = vpow2.f32 %v2362_v1  ;;  %v2363_v8 = vmul.f32 -1.442695, %v1568_v35  ;;  %v2032_v1 = vld [vmem:[#allocation10 + $0x160] sm:$0xff] }
 0x778   :  { %v2028_v35 = vld [vmem:[#allocation10 + $0x140] sm:$0xff] }
 0x779   :  { %3166 = vpow2.f32 %v2363_v8  ;;  %v2027_v8 = vld [vmem:[#allocation10 + $0x138] sm:$0xff] }
 0x784   :  { %v3165_v9 = vpop.eup %3164 }
 0x785   :  { %v1565_v10 = vadd.f32 1.0, %v3165_v9  ;;  %v2026_v9 = vld [vmem:[#allocation10 + $0x130] sm:$0xff] }
 0x786   :  { %v3167_v11 = vpop.eup %3166 }
 0x787   :  { %3168 = vrcp.f32 %v1565_v10  ;;  %v1572_v12 = vadd.f32 1.0, %v3167_v11  ;;  %v2025_v10 = vld [vmem:[#allocation10 + $0x128] sm:$0xff]  ;;  %v2024_v11 = vld [vmem:[#allocation10 + $0x120] sm:$0xff] }
 0x789   :  { %3170 = vrcp.f32 %v1572_v12 }
 0x794   :  { %v3169_v15 = vpop.eup %3168 }
 0x795   :  { %v1575_v16 = vmul.f32 %v3169_v15, %v1558_v14  ;;  %v4620_v15 = vld [vmem:[#allocation49_spill] sm:$0xff] }
 0x796   :  { %v3171_v20 = vpop.eup %3170 }
 0x797   :  { %v1576_v19 = vadd.f32 %v1575_v16, %v4615_v17  ;;  %v1578_v21 = vsub.f32 1.0, %v3171_v20  ;;  %v1580_v24 = vmul.f32 %v3171_v20, %v4313_v37  ;;  %v311_v16 = vadd.f32 %v4620_v15, %v4552_v41  ;;  %v4411_v41 = vld [vmem:[%s4454_s5] ss:$0 sm:$0xff] }
 0x799   :  { %3172 = vtanh.f32 %v1576_v19 }
 0x7a6   :  { %v3173_v22 = vpop.eup %3172 }
 0x7a7   :  { %v1579_v23 = vmul.f32 %v3173_v22, %v1578_v21 }
 0x7a9   :  { %v4391_v25 = vadd.f32 %v1580_v24, %v1579_v23  ;;  %v4621_v24 = vld [vmem:[#allocation52_spill] sm:$0xff] }
 0x7ab   :  { %1647 = vmatmul.mubr.f32.vlgmr.msra.gmra.mxu0 %v4391_v25  ;;  %2906 = vmatmul.mubr.f32.vlgmr.msra.gmra.mxu1 %v4391_v25 }
 0x7ac   :  { %2909 = vmatpush3.msra.mxu0 %v1760_v45  ;;  %2940 = vmatprep.mubr.f32.mxu0 %v4616_v27  ;;  %v1887_v45 = vld [vmem:[#allocation10 + $0xa8] sm:$0xff] }
 0x7ad   :  { %2910 = vmatprep.subr.mxu0 %v1759_v26  ;;  %2953 = vmatpush3.msra.mxu1 %v1897_v43 }
 0x7ae   :  { %2911 = vmatpush3.msra.mxu0 %v1759_v26  ;;  %2954 = vmatprep.subr.mxu1 %v1896_v38  ;;  %v313_v26 = vadd.f32 %v4621_v24, %v3806_v32 }
 0x7af   :  { %2912 = vmatprep.subr.mxu0 %v1758_v28  ;;  %2955 = vmatpush3.msra.mxu1 %v1896_v38 }
 0x7b0   :  { %2913 = vmatpush3.msra.mxu0 %v1758_v28  ;;  %2956 = vmatprep.subr.mxu1 %v1895_v48 }
 0x7b1   :  { %2914 = vmatprep.subr.mxu0 %v1757_v18  ;;  %2957 = vmatpush3.msra.mxu1 %v1895_v48 }
 0x7b2   :  { %2915 = vmatpush3.msra.mxu0 %v1757_v18  ;;  %2958 = vmatprep.subr.mxu1 %v1894_v42 }
 0x7b3   :  { %2916 = vmatprep.subr.mxu0 %v1756_v29  ;;  %2959 = vmatpush3.msra.mxu1 %v1894_v42 }
 0x7b4   :  { %2917 = vmatpush3.msra.mxu0 %v1756_v29  ;;  %2960 = vmatprep.subr.mxu1 %v1893_v36 }
 0x7b5   :  { %2918 = vmatprep.subr.mxu0 %v1755_v30  ;;  %2961 = vmatpush3.msra.mxu1 %v1893_v36 }
 0x7b6   :  { %2919 = vmatpush3.msra.mxu0 %v1755_v30 }
 0x7b7   :  { %2920 = vmatprep.subr.mxu0 %v1754_v50 }
 0x7b8   :  { %2921 = vmatpush3.msra.mxu0 %v1754_v50 }
 0x7b9   :  { %2922 = vmatprep.subr.mxu0 %v1753_v55 }
 0x7ba   :  { %2923 = vmatpush3.msra.mxu0 %v1753_v55 }
 0x7bb   :  { %2924 = vmatprep.subr.mxu0 %v1752_v53 }
 0x7bc   :  { %2925 = vmatpush3.msra.mxu0 %v1752_v53 }
 0x7bd   :  { %2926 = vmatprep.subr.mxu0 %v1751_v51 }
 0x7be   :  { %2927 = vmatpush3.msra.mxu0 %v1751_v51 }
 0x7bf   :  { %2928 = vmatprep.subr.mxu0 %v1750_v60 }
 0x7c0   :  { %2929 = vmatpush3.msra.mxu0 %v1750_v60 }
 0x7c1   :  { %2930 = vmatprep.subr.mxu0 %v1749_v49 }
 0x7c2   :  { %2931 = vmatpush3.msra.mxu0 %v1749_v49 }
 0x7c3   :  { %2932 = vmatprep.subr.mxu0 %v1748_v3 }
 0x7c4   :  { %2933 = vmatpush3.msra.mxu0 %v1748_v3 }
 0x7c5   :  { %2934 = vmatprep.subr.mxu0 %v1747_v52 }
 0x7c6   :  { %2935 = vmatpush3.msra.mxu0 %v1747_v52 }
 0x7c7   :  { %2936 = vmatprep.subr.mxu0 %v1746_v54 }
 0x7c8   :  { %2937 = vmatpush3.msra.mxu0 %v1746_v54 }
 0x7c9   :  { %2938 = vmatprep.subr.mxu0 %v1745_v46 }
 0x7ca   :  { %2939 = vmatpush3.msra.mxu0 %v1745_v46 }
 0x7cb   :  { %2941 = vmatmul.mubr.f32.vlgmr.msra.gmra.mxu0 %v4617_v13  ;;  %2996 = vmatprep.subr.mxu0 %v2035_v5  ;;  %v4622_v13 = vld [vmem:[#allocation43_spill] sm:$0xff] }
 0x7cc   :  { %2943 = vmatprep.mubr.f32.mxu0 %v4618_v47  ;;  %2997 = vmatpush3.msra.mxu0 %v2035_v5  ;;  %v2020_v5 = vld [vmem:[#allocation10 + $0x100] sm:$0xff] }
 0x7cd   :  { %2998 = vmatprep.subr.mxu0 %v2034_v59 }
 0x7ce   :  { %2999 = vmatpush3.msra.mxu0 %v2034_v59  ;;  %v2173_v59 = vld [vmem:[#allocation10 + $0x1f8] sm:$0xff] }
 0x7cf   :  { %2944 = vmatmul.mubr.f32.gmra.mxu0 %v4619_v56  ;;  %3000 = vmatprep.subr.mxu0 %v2033_v34 }
 0x7d0   :  { %2946 = vmatprep.mubr.f32.mxu0 %v4233_v40  ;;  %v1892_v40 = vld [vmem:[#allocation10 + $0xd0] sm:$0xff]  ;;  %3001 = vmatpush3.msra.mxu0 %v2033_v34 }
 0x7d1   :  { %2962 = vmatprep.subr.mxu1 %v1892_v40  ;;  %3002 = vmatprep.subr.mxu0 %v2032_v1  ;;  %v2172_v34 = vld [vmem:[#allocation10 + $0x1f0] sm:$0xff] }
 0x7d2   :  { %2963 = vmatpush3.msra.mxu1 %v1892_v40  ;;  %3003 = vmatpush3.msra.mxu0 %v2032_v1  ;;  %v2170_v1 = vld [vmem:[#allocation10 + $0x1e0] sm:$0xff] }
 0x7d3   :  { %2947 = vmatmul.mubr.f32.gmra.mxu0 %v4313_v37  ;;  %v1891_v37 = vld [vmem:[#allocation10 + $0xc8] sm:$0xff]  ;;  %3004 = vmatprep.subr.mxu0 %v2031_v33 }
 0x7d4   :  { %2949 = vmatprep.mubr.f32.mxu0 %v4391_v25  ;;  %2964 = vmatprep.subr.mxu1 %v1891_v37 }
 0x7d5   :  { %2965 = vmatpush3.msra.mxu1 %v1891_v37  ;;  %3005 = vmatpush3.msra.mxu0 %v2031_v33  ;;  %v2169_v33 = vld [vmem:[#allocation10 + $0x1d8] sm:$0xff] }
 0x7d6   :  { %2966 = vmatprep.subr.mxu1 %v1890_v63  ;;  %3006 = vmatprep.subr.mxu0 %v2030_v6 }
 0x7d7   :  { %2967 = vmatpush3.msra.mxu1 %v1890_v63  ;;  %3007 = vmatpush3.msra.mxu0 %v2030_v6  ;;  %v2168_v6 = vld [vmem:[#allocation10 + $0x1d0] sm:$0xff] }
 0x7d8   :  { %2968 = vmatprep.subr.mxu1 %v1889_v39  ;;  %3008 = vmatprep.subr.mxu0 %v2029_v7 }
 0x7d9   :  { %2969 = vmatpush3.msra.mxu1 %v1889_v39  ;;  %3009 = vmatpush3.msra.mxu0 %v2029_v7  ;;  %v2167_v7 = vld [vmem:[#allocation10 + $0x1c8] sm:$0xff] }
 0x7da   :  { %2970 = vmatprep.subr.mxu1 %v1888_v4  ;;  %3010 = vmatprep.subr.mxu0 %v2028_v35 }
 0x7db   :  { %2971 = vmatpush3.msra.mxu1 %v1888_v4  ;;  %3011 = vmatpush3.msra.mxu0 %v2028_v35  ;;  %v2166_v35 = vld [vmem:[#allocation10 + $0x1c0] sm:$0xff] }
 0x7dc   :  { %2972 = vmatprep.subr.mxu1 %v1887_v45  ;;  %3012 = vmatprep.subr.mxu0 %v2027_v8 }
 0x7dd   :  { %2973 = vmatpush3.msra.mxu1 %v1887_v45  ;;  %3013 = vmatpush3.msra.mxu0 %v2027_v8  ;;  %v2165_v8 = vld [vmem:[#allocation10 + $0x1b8] sm:$0xff] }
 0x7de   :  { %2974 = vmatprep.subr.mxu1 %v1886_v61  ;;  %3014 = vmatprep.subr.mxu0 %v2026_v9 }
 0x7df   :  { %2975 = vmatpush3.msra.mxu1 %v1886_v61  ;;  %3015 = vmatpush3.msra.mxu0 %v2026_v9  ;;  %v2164_v9 = vld [vmem:[#allocation10 + $0x1b0] sm:$0xff] }
 0x7e0   :  { %2976 = vmatprep.subr.mxu1 %v1885_v31  ;;  %3016 = vmatprep.subr.mxu0 %v2025_v10 }
 0x7e1   :  { %2977 = vmatpush3.msra.mxu1 %v1885_v31  ;;  %3017 = vmatpush3.msra.mxu0 %v2025_v10  ;;  %v2163_v10 = vld [vmem:[#allocation10 + $0x1a8] sm:$0xff] }
 0x7e2   :  { %2978 = vmatprep.subr.mxu1 %v1884_v58  ;;  %3018 = vmatprep.subr.mxu0 %v2024_v11 }
 0x7e3   :  { %2979 = vmatpush3.msra.mxu1 %v1884_v58  ;;  %3019 = vmatpush3.msra.mxu0 %v2024_v11  ;;  %v2023_v58 = vld [vmem:[#allocation10 + $0x118] sm:$0xff]  ;;  %v2162_v11 = vld [vmem:[#allocation10 + $0x1a0] sm:$0xff] }
 0x7e4   :  { %2980 = vmatprep.subr.mxu1 %v1883_v2  ;;  %3020 = vmatprep.subr.mxu0 %v2023_v58 }
 0x7e5   :  { %2981 = vmatpush3.msra.mxu1 %v1883_v2  ;;  %3021 = vmatpush3.msra.mxu0 %v2023_v58  ;;  %v2022_v2 = vld [vmem:[#allocation10 + $0x110] sm:$0xff] }
 0x7e6   :  { %2982 = vmatprep.subr.mxu1 %v1882_v62  ;;  %3022 = vmatprep.subr.mxu0 %v2022_v2 }
 0x7e7   :  { %2983 = vmatpush3.msra.mxu1 %v1882_v62  ;;  %3023 = vmatpush3.msra.mxu0 %v2022_v2  ;;  %v2021_v62 = vld [vmem:[#allocation10 + $0x108] sm:$0xff] }
 0x7e8   :  { %3024 = vmatprep.subr.mxu0 %v2021_v62  ;;  %3040 = vmatprep.subr.mxu1 %v2173_v59 }
 0x7e9   :  { %3025 = vmatpush3.msra.mxu0 %v2021_v62 }
 0x7ea   :  { %3026 = vmatprep.subr.mxu0 %v2020_v5 }
 0x7eb   :  { %3027 = vmatpush3.msra.mxu0 %v2020_v5 }
 0x86b   :  { %v1648_v12 = vpop.f32.mrf.mxu0  ;;  %v1719_v14 = vpop.f32.mrf.mxu1 }
 0x86c   :  { %v1649_v17 = vadd.f32 %v1648_v12, %v4613_v57  ;;  %v1720_v32 = vadd.f32 %v1719_v14, %v3812_v44  ;;  %v4425_v12 = vld [vmem:[%s4454_s5 + $0x1] ss:$0 sm:$0xff] }
 0x86d   :  { %v1650_v19 = vpop.f32.mrf.mxu0  ;;  %v2907_v20 = vpop.f32.mrf.mxu1 }
 0x86e   :  { %v1723_v21 = vadd.f32 %v1649_v17, %v311_v16  ;;  %v1651_v23 = vadd.f32 %v1650_v19, %v3804_v0 }
 0x870   :  { %v2364_v22 = vmul.f32 -1.442695, %v1723_v21  ;;  %v1730_v27 = vadd.f32 %v1651_v23, %v313_v26 }
 0x872   :  { %3174 = vpow2.f32 %v2364_v22  ;;  %v2365_v28 = vmul.f32 -1.442695, %v1730_v27 }
 0x874   :  { %3176 = vpow2.f32 %v2365_v28 }
 0x87f   :  { %v3175_v18 = vpop.eup %3174 }
 0x880   :  { %v1727_v29 = vadd.f32 1.0, %v3175_v18 }
 0x881   :  { %v3177_v30 = vpop.eup %3176 }
 0x882   :  { %3178 = vrcp.f32 %v1727_v29  ;;  %v1734_v50 = vadd.f32 1.0, %v3177_v30 }
 0x884   :  { %3180 = vrcp.f32 %v1734_v50 }
 0x88b   :  { %v2942_v57 = vpop.f32.mrf.mxu0 }
 0x88c   :  { %v1840_v0 = vadd.f32 %v2942_v57, %v4411_v41 }
 0x88d   :  { %v1834_v55 = vpop.f32.mrf.mxu0 }
 0x88e   :  { %v1835_v53 = vadd.f32 %v4411_v41, %v1834_v55  ;;  %v1874_v52 = vmax.f32 %v1840_v0, 0.0 }
 0x88f   :  { %v3179_v51 = vpop.eup %3178  ;;  %v2945_v60 = vpop.f32.mrf.mxu0 }
 0x890   :  { %v1737_v49 = vmul.f32 %v3179_v51, %v1720_v32  ;;  %v1873_v3 = vmax.f32 %v1835_v53, 0.0  ;;  %v1850_v54 = vadd.f32 %v2945_v60, %v4411_v41 }
 0x891   :  { %v1844_v46 = vpop.f32.mrf.mxu0  ;;  %v3181_v63 = vpop.eup %3180 }
 0x892   :  { %v1738_v47 = vadd.f32 %v1737_v49, %v4622_v13  ;;  %v1845_v56 = vadd.f32 %v4411_v41, %v1844_v46  ;;  %2984 = vmatprep.mubr.f32.mxu1 %v1873_v3  ;;  %v1876_v38 = vmax.f32 %v1850_v54, 0.0  ;;  %v1740_v39 = vsub.f32 1.0, %v3181_v63  ;;  %v2161_v49 = vld [vmem:[#allocation10 + $0x198] sm:$0xff]  ;;  %v2160_v3 = vld [vmem:[#allocation10 + $0x190] sm:$0xff]  ;;  %v2158_v54 = vld [vmem:[#allocation10 + $0x180] sm:$0xff] }
 0x893   :  { %v2948_v43 = vpop.f32.mrf.mxu0  ;;  %2985 = vmatmul.mubr.f32.vlgmr.msra.gmra.mxu1 %v1874_v52  ;;  %v1742_v61 = vmul.f32 %v3181_v63, %v4391_v25  ;;  %v2171_v25 = vld [vmem:[#allocation10 + $0x1e8] sm:$0xff] }
 0x894   :  { %3182 = vtanh.f32 %v1738_v47  ;;  %v1875_v44 = vmax.f32 %v1845_v56, 0.0  ;;  %v1860_v48 = vadd.f32 %v2948_v43, %v4411_v41  ;;  %3041 = vmatpush3.msra.mxu1 %v2173_v59  ;;  %v2159_v52 = vld [vmem:[#allocation10 + $0x188] sm:$0xff] }
 0x895   :  { %v1854_v42 = vpop.f32.mrf.mxu0  ;;  %3042 = vmatprep.subr.mxu1 %v2172_v34 }
 0x896   :  { %v1855_v36 = vadd.f32 %v4411_v41, %v1854_v42  ;;  %2987 = vmatprep.mubr.f32.mxu1 %v1875_v44  ;;  %v1878_v37 = vmax.f32 %v1860_v48, 0.0  ;;  %3043 = vmatpush3.msra.mxu1 %v2172_v34 }
 0x897   :  { %2988 = vmatmul.mubr.f32.gmra.mxu1 %v1876_v38  ;;  %3044 = vmatprep.subr.mxu1 %v2171_v25 }
 0x898   :  { %v1877_v40 = vmax.f32 %v1855_v36, 0.0  ;;  %3045 = vmatpush3.msra.mxu1 %v2171_v25  ;;  %v2372_v25 = vld [vmem:[%s4454_s5 + $0x3] ss:$0 sm:$0xff] }
 0x899   :  { %3046 = vmatprep.subr.mxu1 %v2170_v1 }
 0x89a   :  { %2990 = vmatprep.mubr.f32.mxu1 %v1877_v40  ;;  %3047 = vmatpush3.msra.mxu1 %v2170_v1 }
 0x89b   :  { %2991 = vmatmul.mubr.f32.gmra.mxu1 %v1878_v37  ;;  %3048 = vmatprep.subr.mxu1 %v2169_v33 }
 0x89c   :  { %3049 = vmatpush3.msra.mxu1 %v2169_v33 }
 0x89d   :  { %3050 = vmatprep.subr.mxu1 %v2168_v6 }
 0x89e   :  { %3051 = vmatpush3.msra.mxu1 %v2168_v6 }
 0x89f   :  { %3052 = vmatprep.subr.mxu1 %v2167_v7 }
 0x8a0   :  { %3053 = vmatpush3.msra.mxu1 %v2167_v7 }
 0x8a1   :  { %v3183_v4 = vpop.eup %3182  ;;  %3054 = vmatprep.subr.mxu1 %v2166_v35 }
 0x8a2   :  { %v1741_v45 = vmul.f32 %v3183_v4, %v1740_v39  ;;  %3055 = vmatpush3.msra.mxu1 %v2166_v35 }
 0x8a3   :  { %3056 = vmatprep.subr.mxu1 %v2165_v8 }
 0x8a4   :  { %v1743_v31 = vadd.f32 %v1742_v61, %v1741_v45  ;;  %3057 = vmatpush3.msra.mxu1 %v2165_v8 }
 0x8a5   :  { %3058 = vmatprep.subr.mxu1 %v2164_v9 }
 0x8a6   :  { %2950 = vmatmul.mubr.f32.gmra.mxu0 %v1743_v31  ;;  %1744 = vst [vmem:[#allocation12] sm:$0xff] %v1743_v31  ;;  %3059 = vmatpush3.msra.mxu1 %v2164_v9 }
 0x8a7   :  { %3060 = vmatprep.subr.mxu1 %v2163_v10 }
 0x8a8   :  { %3061 = vmatpush3.msra.mxu1 %v2163_v10 }
 0x8a9   :  { %3062 = vmatprep.subr.mxu1 %v2162_v11 }
 0x8aa   :  { %3063 = vmatpush3.msra.mxu1 %v2162_v11 }
 0x8ab   :  { %3064 = vmatprep.subr.mxu1 %v2161_v49 }
 0x8ac   :  { %3065 = vmatpush3.msra.mxu1 %v2161_v49 }
 0x8ad   :  { %3066 = vmatprep.subr.mxu1 %v2160_v3 }
 0x8ae   :  { %3067 = vmatpush3.msra.mxu1 %v2160_v3 }
 0x8af   :  { %3068 = vmatprep.subr.mxu1 %v2159_v52 }
 0x8b0   :  { %3069 = vmatpush3.msra.mxu1 %v2159_v52 }
 0x8b1   :  { %3070 = vmatprep.subr.mxu1 %v2158_v54 }
 0x8b2   :  { %3071 = vmatpush3.msra.mxu1 %v2158_v54 }
 0x953   :  { %v2986_v14 = vpop.f32.mrf.mxu1 }
 0x954   :  { %v1978_v15 = vadd.f32 %v2986_v14, %v4425_v12 }
 0x955   :  { %v1972_v16 = vpop.f32.mrf.mxu1 }
 0x956   :  { %v1973_v17 = vadd.f32 %v4425_v12, %v1972_v16  ;;  %v2012_v21 = vmax.f32 %v1978_v15, 0.0 }
 0x957   :  { %v2989_v19 = vpop.f32.mrf.mxu1 }
 0x958   :  { %v2011_v20 = vmax.f32 %v1973_v17, 0.0  ;;  %v1988_v22 = vadd.f32 %v2989_v19, %v4425_v12 }
 0x959   :  { %v1982_v23 = vpop.f32.mrf.mxu1 }
 0x95a   :  { %v1983_v24 = vadd.f32 %v4425_v12, %v1982_v23  ;;  %3028 = vmatprep.mubr.f32.mxu0 %v2011_v20  ;;  %v2014_v28 = vmax.f32 %v1988_v22, 0.0 }
 0x95b   :  { %v2992_v26 = vpop.f32.mrf.mxu1  ;;  %3029 = vmatmul.mubr.f32.vlgmr.msra.gmra.mxu0 %v2012_v21 }
 0x95c   :  { %v2013_v27 = vmax.f32 %v1983_v24, 0.0  ;;  %v1998_v18 = vadd.f32 %v2992_v26, %v4425_v12 }
 0x95d   :  { %v1992_v29 = vpop.f32.mrf.mxu1 }
 0x95e   :  { %v1993_v30 = vadd.f32 %v4425_v12, %v1992_v29  ;;  %3031 = vmatprep.mubr.f32.mxu0 %v2013_v27  ;;  %v2016_v50 = vmax.f32 %v1998_v18, 0.0 }
 0x95f   :  { %3032 = vmatmul.mubr.f32.gmra.mxu0 %v2014_v28 }
 0x960   :  { %v2015_v57 = vmax.f32 %v1993_v30, 0.0 }
 0x962   :  { %3034 = vmatprep.mubr.f32.mxu0 %v2015_v57 }
 0x963   :  { %3035 = vmatmul.mubr.f32.gmra.mxu0 %v2016_v50 }
 0x966   :  { %v2951_v0 = vpop.f32.mrf.mxu0 }
 0x967   :  { %v1870_v55 = vadd.f32 %v2951_v0, %v4411_v41 }
 0x968   :  { %v1864_v32 = vpop.f32.mrf.mxu0 }
 0x969   :  { %v1865_v53 = vadd.f32 %v4411_v41, %v1864_v32  ;;  %v1880_v60 = vmax.f32 %v1870_v55, 0.0  ;;  %v2370_v41 = vld [vmem:[%s4454_s5 + $0x2] ss:$0 sm:$0xff]  ;;  %s3416_s5 = smov [#allocation12]  }
 0x96a   :  { %s2319_s16 = sshll.u32 %s3416_s5, 4  ;;  %s2320_s16 = int_to_ptr.vmem [resolvable:$true] %s2319_s16 }
 0x96b   :  { %v1879_v51 = vmax.f32 %v1865_v53, 0.0  ;;  %s3348_s17 = scalar_lea.vmem %s2320_s16, 128  ;;  %p3353_p12 = scmp.lt.s32.totalorder %s2320_s16, %s2320_s16 }
 0x96c   :  { %p3349_p11 = scmp.ne.s32.totalorder %s2320_s16, %s3348_s17  ;;  %p3354_p13 = scmp.lt.s32.totalorder %s3348_s17, %s3348_s17 }
 0x96d   :  { %2993 = vmatprep.mubr.f32.mxu1 %v1879_v51 }
 0x96e   :  { %2994 = vmatmul.mubr.f32.gmra.mxu1 %v1880_v60  ;;  %p3355_p0 = por %p3354_p13, %p3353_p12 }
 0x970   :  { %p3356_p1 = pnand %p3355_p0, %p3349_p11 }
 0xa1b   :  { %v3030_v46 = vpop.f32.mrf.mxu0 }
 0xa1c   :  { %v2116_v13 = vadd.f32 %v3030_v46, %v2370_v41 }
 0xa1d   :  { %v2110_v47 = vpop.f32.mrf.mxu0 }
 0xa1e   :  { %v2111_v56 = vadd.f32 %v2370_v41, %v2110_v47  ;;  %v2150_v38 = vmax.f32 %v2116_v13, 0.0 }
 0xa1f   :  { %v3033_v43 = vpop.f32.mrf.mxu0 }
 0xa20   :  { %v2149_v44 = vmax.f32 %v2111_v56, 0.0  ;;  %v2126_v48 = vadd.f32 %v3033_v43, %v2370_v41 }
 0xa21   :  { %v2120_v42 = vpop.f32.mrf.mxu0 }
 0xa22   :  { %v2121_v36 = vadd.f32 %v2370_v41, %v2120_v42  ;;  %3072 = vmatprep.mubr.f32.mxu1 %v2149_v44  ;;  %v2152_v63 = vmax.f32 %v2126_v48, 0.0 }
 0xa23   :  { %v3036_v40 = vpop.f32.mrf.mxu0  ;;  %3073 = vmatmul.mubr.f32.vlgmr.msra.gmra.mxu1 %v2150_v38 }
 0xa24   :  { %v2151_v37 = vmax.f32 %v2121_v36, 0.0  ;;  %v2136_v39 = vadd.f32 %v3036_v40, %v2370_v41 }
 0xa25   :  { %v2130_v4 = vpop.f32.mrf.mxu0 }
 0xa26   :  { %v2131_v45 = vadd.f32 %v2370_v41, %v2130_v4  ;;  %3075 = vmatprep.mubr.f32.mxu1 %v2151_v37  ;;  %v2154_v31 = vmax.f32 %v2136_v39, 0.0 }
 0xa27   :  { %3076 = vmatmul.mubr.f32.gmra.mxu1 %v2152_v63 }
 0xa28   :  { %v2153_v61 = vmax.f32 %v2131_v45, 0.0 }
 0xa2a   :  { %3078 = vmatprep.mubr.f32.mxu1 %v2153_v61 }
 0xa2b   :  { %3079 = vmatmul.mubr.f32.gmra.mxu1 %v2154_v31 }
 0xa2e   :  { %v2995_v58 = vpop.f32.mrf.mxu1 }
 0xa2f   :  { %v2008_v2 = vadd.f32 %v2995_v58, %v4425_v12 }
 0xa30   :  { %v2002_v62 = vpop.f32.mrf.mxu1 }
 0xa31   :  { %v2003_v5 = vadd.f32 %v4425_v12, %v2002_v62  ;;  %v2018_v34 = vmax.f32 %v2008_v2, 0.0 }
 0xa33   :  { %v2017_v59 = vmax.f32 %v2003_v5, 0.0 }
 0xa35   :  { %3037 = vmatprep.mubr.f32.mxu0 %v2017_v59 }
 0xa36   :  { %3038 = vmatmul.mubr.f32.gmra.mxu0 %v2018_v34 }
 0xae3   :  { %v3074_v1 = vpop.f32.mrf.mxu1 }
 0xae4   :  { %v2254_v33 = vadd.f32 %v3074_v1, %v2372_v25 }
 0xae5   :  { %v2248_v6 = vpop.f32.mrf.mxu1 }
 0xae6   :  { %3184 = vtanh.f32 %v2254_v33  ;;  %v2249_v7 = vadd.f32 %v2372_v25, %v2248_v6 }
 0xae7   :  { %v3077_v35 = vpop.f32.mrf.mxu1 }
 0xae8   :  { %3186 = vtanh.f32 %v2249_v7  ;;  %v2264_v8 = vadd.f32 %v3077_v35, %v2372_v25 }
 0xae9   :  { %v2258_v9 = vpop.f32.mrf.mxu1 }
 0xaea   :  { %3188 = vtanh.f32 %v2264_v8  ;;  %v2259_v10 = vadd.f32 %v2372_v25, %v2258_v9 }
 0xaeb   :  { %v3080_v11 = vpop.f32.mrf.mxu1 }
 0xaec   :  { %3190 = vtanh.f32 %v2259_v10  ;;  %v2274_v12 = vadd.f32 %v3080_v11, %v2372_v25 }
 0xaed   :  { %v2268_v14 = vpop.f32.mrf.mxu1 }
 0xaee   :  { %3192 = vtanh.f32 %v2274_v12  ;;  %v2269_v15 = vadd.f32 %v2372_v25, %v2268_v14 }
 0xaf0   :  { %3194 = vtanh.f32 %v2269_v15 }
 0xaf3   :  { %v3185_v16 = vpop.eup %3184 }
 0xaf4   :  { %2296 = vst [vmem:[#allocation11 + $0x8] sm:$0xff] %v3185_v16 }
 0xaf5   :  { %v3187_v17 = vpop.eup %3186 }
 0xaf6   :  { %2295 = vst [vmem:[#allocation11] sm:$0xff] %v3187_v17  ;;  %v3039_v19 = vpop.f32.mrf.mxu0 }
 0xaf7   :  { %v3189_v20 = vpop.eup %3188  ;;  %v2146_v21 = vadd.f32 %v3039_v19, %v2370_v41 }
 0xaf8   :  { %2298 = vst [vmem:[#allocation11 + $0x18] sm:$0xff] %v3189_v20  ;;  %v2140_v22 = vpop.f32.mrf.mxu0 }
 0xaf9   :  { %v3191_v23 = vpop.eup %3190  ;;  %v2141_v24 = vadd.f32 %v2370_v41, %v2140_v22  ;;  %v2156_v28 = vmax.f32 %v2146_v21, 0.0 }
 0xafa   :  { %2297 = vst [vmem:[#allocation11 + $0x10] sm:$0xff] %v3191_v23 }
 0xafb   :  { %v3193_v26 = vpop.eup %3192  ;;  %v2155_v27 = vmax.f32 %v2141_v24, 0.0 }
 0xafc   :  { %2300 = vst [vmem:[#allocation11 + $0x28] sm:$0xff] %v3193_v26 }
 0xafd   :  { %v3195_v18 = vpop.eup %3194  ;;  %3081 = vmatprep.mubr.f32.mxu1 %v2155_v27 }
 0xafe   :  { %2299 = vst [vmem:[#allocation11 + $0x20] sm:$0xff] %v3195_v18  ;;  %3082 = vmatmul.mubr.f32.gmra.mxu1 %v2156_v28 }
 0xaff   :  { %3359 = shalt.err (!%p3356_p1)
}
 0xb00   :  { %2322 = dma.vmem_to_hbm [thread:$0]  %s2320_s16, 128, %s4456_s7, [#allocation13]  }
 0xb01   :  { %s3417_s19 = smov [#allocation11]  }
 0xb02   :  { %s2309_s20 = sshll.u32 %s3417_s19, 4  ;;  %s2310_s20 = int_to_ptr.vmem [resolvable:$true] %s2309_s20 }
 0xb03   :  { %s3368_s21 = scalar_lea.vmem %s2310_s20, 1024  ;;  %p3373_p3 = scmp.lt.s32.totalorder %s2310_s20, %s2310_s20 }
 0xb04   :  { %p3369_p2 = scmp.ne.s32.totalorder %s2310_s20, %s3368_s21  ;;  %p3374_p4 = scmp.lt.s32.totalorder %s3368_s21, %s3368_s21 }
 0xb06   :  { %p3375_p5 = por %p3374_p4, %p3373_p3 }
 0xb08   :  { %p3376_p6 = pnand %p3375_p5, %p3369_p2 }
 0xbbe   :  { %v3083_v29 = vpop.f32.mrf.mxu1 }
 0xbbf   :  { %v2284_v30 = vadd.f32 %v3083_v29, %v2372_v25 }
 0xbc0   :  { %v2278_v57 = vpop.f32.mrf.mxu1 }
 0xbc1   :  { %3196 = vtanh.f32 %v2284_v30  ;;  %v2279_v50 = vadd.f32 %v2372_v25, %v2278_v57 }
 0xbc3   :  { %3198 = vtanh.f32 %v2279_v50 }
 0xbce   :  { %v3197_v0 = vpop.eup %3196 }
 0xbcf   :  { %2302 = vst [vmem:[#allocation11 + $0x38] sm:$0xff] %v3197_v0 }
 0xbd0   :  { %v3199_v55 = vpop.eup %3198 }
 0xbd1   :  { %2301 = vst [vmem:[#allocation11 + $0x30] sm:$0xff] %v3199_v55 }
 0xbd2   :  { %3379 = shalt.err (!%p3376_p6)
}
 0xbd3   :  { %2312 = dma.vmem_to_hbm [thread:$0]  %s2310_s20, 1024, %s4455_s6, [#allocation4]  }
 0xbd4   :  { %3394 = dma.done.wait [#allocation4], 1024  }
 0xbd5   :  { %3395 = vsyncadd [#allocation4], 4294966272 }
 0xbd6   :  { %3396 = dma.done.wait [#allocation13], 128  }
 0xbd7   :  { %3397 = vsyncadd [#allocation13], 4294967168 }
 0xbd8   :  { %2329 = vsyncpa [#allocation3], 1 }
 0xbd9   :  { %2330 = vsyncpa [#allocation6], 1 }
 0xbda   :  { %2331 = vsyncpa [#allocation9], 1 }
 0xbdb   :  { %2332 = vsyncpa [#allocation4], 1 }
 0xbdc   :  { %2333 = vsyncpa [#allocation13], 1 }

</bundles_post_ra>
